<compile_context>
chip_gen: v7x
topology: tpu7x:2x2x1
jax: 0.10.0
libtpu: 0.0.40
codegen_flags: <defaults>
</compile_context>

<pallas_src>
import numpy as np
import jax
import jax.numpy as jnp
from jax.experimental import pallas as pl
from jax.experimental.pallas import tpu as pltpu


def _make_concat_mean_kernel(n_layers: int, hidden_size: int, inv_layers: float):
    """Kernel over grid (batch_tiles, seq_tiles); seq axis is the reduction axis."""

    def kernel(ids_ref, att_ref, typ_ref, fp_ref, *rest):
        h_refs = rest[:n_layers]          # each (TB, TS, H) bf16
        o_ref = rest[n_layers]            # (TB, 2H) f32 (resident across seq axis)
        acc_ref = rest[n_layers + 1]      # (TB, 2, H) f32 scratch (sums)
        cnt_ref = rest[n_layers + 2]      # (TB, 2, 1) f32 scratch (counts)

        s_idx = pl.program_id(1)

        @pl.when(s_idx == 0)
        def _init():
            acc_ref[...] = jnp.zeros_like(acc_ref)
            cnt_ref[...] = jnp.zeros_like(cnt_ref)

        ids = ids_ref[...]                # (TB, TS) int32
        att = att_ref[...]
        typ = typ_ref[...]
        fp = fp_ref[...]                  # (TB, 1) int32 first-pad index per row
        TB, TS = ids.shape

        # torch loop, vectorized per tile:
        #   `break` at first pad  -> global position < first-pad index of the row
        #   `continue` on CLS/SEP -> ids not in {101, 102}
        #   keep attention_mask == 1
        pos = jax.lax.broadcasted_iota(jnp.int32, (TB, TS), 1) + s_idx * TS
        base = (pos < fp) & (ids != 101) & (ids != 102) & (att == 1)

        # masks[:, 0, :] -> term tokens (token_type==0); masks[:, 1, :] -> text.
        slot_is_text = jax.lax.broadcasted_iota(jnp.int32, (TB, 2, TS), 1) == 1
        tok_is_text = (typ != 0)[:, None, :]
        masks = ((slot_is_text == tok_is_text) & base[:, None, :]).astype(jnp.float32)

        cnt_ref[...] += jnp.sum(masks, axis=2, keepdims=True)

        # Masked sums via MXU contraction over the seq tile; accumulate over
        # layers too (fused layer-interval mean: each layer read exactly once).
        mm = masks.astype(h_refs[0].dtype)           # 0/1 exact in bf16
        acc = acc_ref[...]
        for h_ref in h_refs:
            acc = acc + jnp.einsum('bks,bsh->bkh', mm, h_ref[...],
                                   preferred_element_type=jnp.float32)
        acc_ref[...] = acc

        @pl.when(s_idx == pl.num_programs(1) - 1)
        def _finalize():
            # Clamp counts: the torch reference would crash on an empty term/text
            # group; here empty groups produce zeros instead of NaN/inf.
            denom = jnp.maximum(cnt_ref[...], 1.0)
            res = acc_ref[...] * (inv_layers / denom)     # (TB, 2, H) f32
            o_ref[:, :hidden_size] = res[:, 0, :]         # lane-dense halves,
            o_ref[:, hidden_size:] = res[:, 1, :]         # no concat copy

    return kernel


def _pick_ts(S, TB, H, n_layers, budget_bytes=24 << 20):
    """Largest 128-aligned seq tile that keeps L * 2 buffers * tile <= budget.

    128 alignment is required by the (TB, TS) mask BlockSpecs; budget is sized
    so the hidden-state DMA buffers stay under ~24 MiB (v7x scoped-VMEM safe).
    """
    cands = [c for c in (2048, 1024, 512, 256, 128) if S % c == 0]
    if not cands:
        return S  # no 128-aligned tiling possible; fall back to full extent
    per_step = lambda ts: n_layers * 2 * TB * ts * H * 2  # bf16 bytes
    for ts in cands:
        if per_step(ts) <= budget_bytes:
            return ts
    return cands[-1]


def custom_pooling(hidden_states, input_ids, attention_mask, token_type_ids,
                   pooling='concat-mean', layer=(-1,), tile_s=None):
    """hidden_states: list/tuple of (B, S, H) arrays (BERT per-layer outputs)."""
    assert pooling == 'concat-mean'
    # TODO(synk): 'cls' (pooler_output passthrough), 'concat-max' and
    # 'reduce-mean'/'reduce-max' variants are trivial variations not implemented.

    # --- layer selection (matches the torch branch logic); the mean over the
    # --- selected interval is fused into the kernel (each layer read once).
    if len(layer) == 2:
        if layer[1] == -1:
            hs = list(hidden_states[layer[0]:])
        else:
            hs = list(hidden_states[layer[0]:layer[1] + 1])
    else:
        hs = [hidden_states[layer[0]]]
    n_layers = len(hs)
    B, S, H = hs[0].shape

    # Mem-bound kernel: ship bf16 over HBM, accumulate in f32 inside.
    hs = [h.astype(jnp.bfloat16) for h in hs]

    ids = input_ids.astype(jnp.int32)
    att = attention_mask.astype(jnp.int32)
    typ = token_type_ids.astype(jnp.int32)

    # "break at first pad" must carry across seq tiles: precompute per-row
    # first-pad index (tiny (B,S) int32 glue).
    iota = jnp.arange(S, dtype=jnp.int32)[None, :]
    first_pad = jnp.min(jnp.where(ids == 0, iota, S), axis=1, keepdims=True)
    first_pad = first_pad.astype(jnp.int32)                       # (B, 1)

    # --- tiling -------------------------------------------------------------
    TB = 8 if (B % 8 == 0) else B
    if tile_s is not None and S % tile_s == 0 and (tile_s % 128 == 0 or tile_s == S):
        TS = tile_s
    else:
        TS = _pick_ts(S, TB, H, n_layers)

    grid = (B // TB, S // TS)

    mask_spec = pl.BlockSpec((TB, TS), lambda b, s: (b, s))
    h_spec = pl.BlockSpec((TB, TS, H), lambda b, s: (b, s, 0))

    kernel = _make_concat_mean_kernel(n_layers, H, 1.0 / n_layers)

    out = pl.pallas_call(
        kernel,
        out_shape=jax.ShapeDtypeStruct((B, 2 * H), jnp.float32),
        grid=grid,
        in_specs=[mask_spec, mask_spec, mask_spec,
                  pl.BlockSpec((TB, 1), lambda b, s: (b, 0))]
                 + [h_spec] * n_layers,
        out_specs=pl.BlockSpec((TB, 2 * H), lambda b, s: (b, 0)),
        scratch_shapes=[pltpu.VMEM((TB, 2, H), jnp.float32),
                        pltpu.VMEM((TB, 2, 1), jnp.float32)],
        compiler_params=pltpu.CompilerParams(
            dimension_semantics=("parallel", "arbitrary")),
    )(ids, att, typ, first_pad, *hs)
    return out


# --------------------------------------------------------------------------- #
#                       reference + self-test                                  #
# --------------------------------------------------------------------------- #
def _reference_numpy(hidden, input_ids, attention_mask, token_type_ids):
    """Direct port of the torch per-batch loop (concat-mean) for verification."""
    hidden = np.asarray(hidden, dtype=np.float32)
    B, S, H = hidden.shape
    out = []
    for b in range(B):
        term, text = [], []
        for i in range(S):
            if input_ids[b, i] in (101, 102):
                continue
            if input_ids[b, i] == 0:
                break
            if attention_mask[b, i] == 1:
                (term if token_type_ids[b, i] == 0 else text).append(hidden[b, i])
        term = np.stack(term, 0).mean(0)
        text = np.stack(text, 0).mean(0)
        out.append(np.concatenate([term, text]))
    return np.stack(out, 0)


def _bf16_round(x):
    return np.asarray(jnp.asarray(x).astype(jnp.bfloat16).astype(jnp.float32))


if __name__ == "__main__":
    B, S, H, n_layers = 16, 256, 128, 6
    key = jax.random.PRNGKey(0)
    keys = jax.random.split(key, n_layers)
    hidden_states = [jax.random.normal(k, (B, S, H), dtype=jnp.float32) for k in keys]

    # [CLS]=101, [SEP]=102, pad=0; token_type 0 = term segment, 1 = text segment.
    input_ids = np.zeros((B, S), dtype=np.int32)
    token_type_ids = np.zeros((B, S), dtype=np.int32)
    attention_mask = np.zeros((B, S), dtype=np.int32)
    rng = np.random.default_rng(0)
    for b in range(B):
        term_len = int(rng.integers(2, 8))
        text_len = int(rng.integers(4, 40))
        toks = ([101] + list(rng.integers(1000, 2000, term_len)) + [102]
                + list(rng.integers(1000, 2000, text_len)) + [102])
        n = len(toks)
        input_ids[b, :n] = toks
        attention_mask[b, :n] = 1
        token_type_ids[b, term_len + 2:n] = 1

    j_ids = jnp.asarray(input_ids)
    j_att = jnp.asarray(attention_mask)
    j_typ = jnp.asarray(token_type_ids)

    # ---- layer-interval path (fused layer mean), forced multi-step seq grid --
    out_interval = custom_pooling(hidden_states, j_ids, j_att, j_typ,
                                  pooling='concat-mean', layer=(-4, -1), tile_s=128)
    out_interval = jax.block_until_ready(out_interval)
    hidden_ref = np.mean(np.stack([_bf16_round(h) for h in hidden_states[-4:]]), axis=0)
    ref_interval = _reference_numpy(hidden_ref, input_ids, attention_mask, token_type_ids)
    assert out_interval.shape == (B, 2 * H)
    np.testing.assert_allclose(np.asarray(out_interval), ref_interval, rtol=1e-4, atol=1e-4)

    # ---- single-layer path ---------------------------------------------------
    out_last = custom_pooling(hidden_states, j_ids, j_att, j_typ,
                              pooling='concat-mean', layer=(-1,))
    out_last = jax.block_until_ready(out_last)
    ref_last = _reference_numpy(_bf16_round(hidden_states[-1]),
                                input_ids, attention_mask, token_type_ids)
    np.testing.assert_allclose(np.asarray(out_last), ref_last, rtol=1e-4, atol=1e-4)

    print("KERNEL_OK")
</pallas_src>

<mosaic_0001>
module attributes {stable_mosaic.version = 11 : i64} {
  func.func @kernel(%arg0: i32, %arg1: i32, %arg2: memref<8x128xi32, #tpu.memory_space<vmem>>, %arg3: memref<8x128xi32, #tpu.memory_space<vmem>>, %arg4: memref<8x128xi32, #tpu.memory_space<vmem>>, %arg5: memref<8x1xi32, #tpu.memory_space<vmem>>, %arg6: memref<8x128x128xbf16, #tpu.memory_space<vmem>>, %arg7: memref<8x128x128xbf16, #tpu.memory_space<vmem>>, %arg8: memref<8x128x128xbf16, #tpu.memory_space<vmem>>, %arg9: memref<8x128x128xbf16, #tpu.memory_space<vmem>>, %arg10: memref<8x256xf32, #tpu.memory_space<vmem>>, %arg11: memref<8x2x128xf32, #tpu.memory_space<vmem>>, %arg12: memref<8x2x1xf32, #tpu.memory_space<vmem>>) attributes {dimension_semantics = [#tpu.dimension_semantics<parallel>, #tpu.dimension_semantics<arbitrary>], iteration_bounds = array<i64: 2, 2>, scalar_prefetch = 0 : i64, scratch_operands = 2 : i64, tpu.core_type = #tpu.core_type<tc>, window_params = [{transform_indices = @transform_0, window_bounds = array<i64: 8, 128>}, {transform_indices = @transform_1, window_bounds = array<i64: 8, 128>}, {transform_indices = @transform_2, window_bounds = array<i64: 8, 128>}, {transform_indices = @transform_3, window_bounds = array<i64: 8, 1>}, {transform_indices = @transform_4, window_bounds = array<i64: 8, 128, 128>}, {transform_indices = @transform_5, window_bounds = array<i64: 8, 128, 128>}, {transform_indices = @transform_6, window_bounds = array<i64: 8, 128, 128>}, {transform_indices = @transform_7, window_bounds = array<i64: 8, 128, 128>}, {transform_indices = @transform_8, window_bounds = array<i64: 8, 256>}]} {
    %c0_i32 = arith.constant 0 : i32
    %0 = arith.cmpi eq, %arg1, %c0_i32 : i32
    %1 = arith.extui %0 : i1 to i32
    %c0_i32_0 = arith.constant 0 : i32
    %2 = arith.cmpi ne, %1, %c0_i32_0 : i32
    scf.if %2 {
      %cst_41 = arith.constant 0.000000e+00 : f32
      %60 = vector.broadcast %cst_41 : f32 to vector<8x2x128xf32>
      %c0_42 = arith.constant 0 : index
      %c0_43 = arith.constant 0 : index
      %c0_44 = arith.constant 0 : index
      %61 = vector.load %arg11[%c0_42, %c0_43, %c0_44] : memref<8x2x128xf32, #tpu.memory_space<vmem>>, vector<8x2x128xf32>
      tpu.vector_store %arg11[%c0_42, %c0_43, %c0_44], %60 {strides = array<i32>} : memref<8x2x128xf32, #tpu.memory_space<vmem>>, vector<8x2x128xf32>,
      %cst_45 = arith.constant 0.000000e+00 : f32
      %62 = vector.broadcast %cst_45 : f32 to vector<8x2x1xf32>
      %c0_46 = arith.constant 0 : index
      %c0_47 = arith.constant 0 : index
      %c0_48 = arith.constant 0 : index
      %63 = vector.load %arg12[%c0_46, %c0_47, %c0_48] : memref<8x2x1xf32, #tpu.memory_space<vmem>>, vector<8x2x1xf32>
      tpu.vector_store %arg12[%c0_46, %c0_47, %c0_48], %62 {strides = array<i32>} : memref<8x2x1xf32, #tpu.memory_space<vmem>>, vector<8x2x1xf32>,
    } else {
    }
    %c0 = arith.constant 0 : index
    %c0_1 = arith.constant 0 : index
    %3 = vector.load %arg2[%c0, %c0_1] : memref<8x128xi32, #tpu.memory_space<vmem>>, vector<8x128xi32>
    %c0_2 = arith.constant 0 : index
    %c0_3 = arith.constant 0 : index
    %4 = vector.load %arg3[%c0_2, %c0_3] : memref<8x128xi32, #tpu.memory_space<vmem>>, vector<8x128xi32>
    %c0_4 = arith.constant 0 : index
    %c0_5 = arith.constant 0 : index
    %5 = vector.load %arg4[%c0_4, %c0_5] : memref<8x128xi32, #tpu.memory_space<vmem>>, vector<8x128xi32>
    %c0_6 = arith.constant 0 : index
    %c0_7 = arith.constant 0 : index
    %6 = vector.load %arg5[%c0_6, %c0_7] : memref<8x1xi32, #tpu.memory_space<vmem>>, vector<8x1xi32>
    %7 = tpu.iota {dimensions = array<i32: 1>} : vector<8x128xi32>
    %c128_i32 = arith.constant 128 : i32
    %8 = arith.muli %arg1, %c128_i32 : i32
    %9 = vector.broadcast %8 : i32 to vector<8x128xi32>
    %10 = arith.addi %7, %9 : vector<8x128xi32>
    %11 = vector.broadcast %6 : vector<8x1xi32> to vector<8x128xi32>
    %12 = arith.cmpi slt, %10, %11 : vector<8x128xi32>
    %c101_i32 = arith.constant 101 : i32
    %13 = vector.broadcast %c101_i32 : i32 to vector<8x128xi32>
    %14 = arith.cmpi ne, %3, %13 : vector<8x128xi32>
    %15 = arith.andi %12, %14 : vector<8x128xi1>
    %c102_i32 = arith.constant 102 : i32
    %16 = vector.broadcast %c102_i32 : i32 to vector<8x128xi32>
    %17 = arith.cmpi ne, %3, %16 : vector<8x128xi32>
    %18 = arith.andi %15, %17 : vector<8x128xi1>
    %c1_i32 = arith.constant 1 : i32
    %19 = vector.broadcast %c1_i32 : i32 to vector<8x128xi32>
    %20 = arith.cmpi eq, %4, %19 : vector<8x128xi32>
    %21 = arith.andi %18, %20 : vector<8x128xi1>
    %22 = tpu.iota {dimensions = array<i32: 1>} : vector<8x2x128xi32>
    %c1_i32_8 = arith.constant 1 : i32
    %23 = vector.broadcast %c1_i32_8 : i32 to vector<8x2x128xi32>
    %24 = arith.cmpi eq, %22, %23 : vector<8x2x128xi32>
    %c0_i32_9 = arith.constant 0 : i32
    %25 = vector.broadcast %c0_i32_9 : i32 to vector<8x128xi32>
    %26 = arith.cmpi ne, %5, %25 : vector<8x128xi32>
    %27 = vector.shape_cast %26 : vector<8x128xi1> to vector<8x1x128xi1>
    %28 = vector.broadcast %27 : vector<8x1x128xi1> to vector<8x2x128xi1>
    %29 = vector.broadcast %28 : vector<8x2x128xi1> to vector<8x2x128xi1>
    %30 = arith.xori %24, %29 : vector<8x2x128xi1>
    %cst = arith.constant dense<true> : vector<8x2x128xi1>
    %31 = arith.xori %30, %cst : vector<8x2x128xi1>
    %32 = vector.shape_cast %21 : vector<8x128xi1> to vector<8x1x128xi1>
    %33 = vector.broadcast %32 : vector<8x1x128xi1> to vector<8x2x128xi1>
    %34 = arith.andi %31, %33 : vector<8x2x128xi1>
    %35 = arith.extui %34 : vector<8x2x128xi1> to vector<8x2x128xi32>
    %36 = arith.sitofp %35 : vector<8x2x128xi32> to vector<8x2x128xf32>
    %c0_10 = arith.constant 0 : index
    %c0_11 = arith.constant 0 : index
    %c0_12 = arith.constant 0 : index
    %37 = vector.load %arg12[%c0_10, %c0_11, %c0_12] : memref<8x2x1xf32, #tpu.memory_space<vmem>>, vector<8x2x1xf32>
    %cst_13 = arith.constant dense<0.000000e+00> : vector<8x2xf32>
    %38 = vector.multi_reduction <add>, %36, %cst_13 [2] : vector<8x2x128xf32> to vector<8x2xf32>
    %39 = vector.shape_cast %38 : vector<8x2xf32> to vector<8x2x1xf32>
    %40 = arith.addf %37, %39 : vector<8x2x1xf32>
    %c0_14 = arith.constant 0 : index
    %c0_15 = arith.constant 0 : index
    %c0_16 = arith.constant 0 : index
    %41 = vector.load %arg12[%c0_14, %c0_15, %c0_16] : memref<8x2x1xf32, #tpu.memory_space<vmem>>, vector<8x2x1xf32>
    tpu.vector_store %arg12[%c0_14, %c0_15, %c0_16], %40 {strides = array<i32>} : memref<8x2x1xf32, #tpu.memory_space<vmem>>, vector<8x2x1xf32>,
    %42 = arith.truncf %36 : vector<8x2x128xf32> to vector<8x2x128xbf16>
    %c0_17 = arith.constant 0 : index
    %c0_18 = arith.constant 0 : index
    %c0_19 = arith.constant 0 : index
    %43 = vector.load %arg11[%c0_17, %c0_18, %c0_19] : memref<8x2x128xf32, #tpu.memory_space<vmem>>, vector<8x2x128xf32>
    %c0_20 = arith.constant 0 : index
    %c0_21 = arith.constant 0 : index
    %c0_22 = arith.constant 0 : index
    %44 = vector.load %arg6[%c0_20, %c0_21, %c0_22] : memref<8x128x128xbf16, #tpu.memory_space<vmem>>, vector<8x128x128xbf16>
    "tpu.trace_start"() <{level = 10 : i32, message = "bks,bsh->bkh"}> : () -> ()
    %cst_23 = arith.constant dense<0.000000e+00> : vector<8x2x128xf32>
    %45 = tpu.matmul %42, %44, %cst_23 {dimension_numbers = #tpu.dot_dimension_numbers<[2], [1], [1], [2], [0, 0, 0, 1, 1, 2], [0], [0]>} : vector<8x2x128xbf16>, vector<8x128x128xbf16>, vector<8x2x128xf32> -> vector<8x2x128xf32>
    "tpu.trace_stop"() : () -> ()
    %46 = arith.addf %43, %45 : vector<8x2x128xf32>
    %c0_24 = arith.constant 0 : index
    %c0_25 = arith.constant 0 : index
    %c0_26 = arith.constant 0 : index
    %47 = vector.load %arg7[%c0_24, %c0_25, %c0_26] : memref<8x128x128xbf16, #tpu.memory_space<vmem>>, vector<8x128x128xbf16>
    "tpu.trace_start"() <{level = 10 : i32, message = "bks,bsh->bkh"}> : () -> ()
    %cst_27 = arith.constant dense<0.000000e+00> : vector<8x2x128xf32>
    %48 = tpu.matmul %42, %47, %cst_27 {dimension_numbers = #tpu.dot_dimension_numbers<[2], [1], [1], [2], [0, 0, 0, 1, 1, 2], [0], [0]>} : vector<8x2x128xbf16>, vector<8x128x128xbf16>, vector<8x2x128xf32> -> vector<8x2x128xf32>
    "tpu.trace_stop"() : () -> ()
    %49 = arith.addf %46, %48 : vector<8x2x128xf32>
    %c0_28 = arith.constant 0 : index
    %c0_29 = arith.constant 0 : index
    %c0_30 = arith.constant 0 : index
    %50 = vector.load %arg8[%c0_28, %c0_29, %c0_30] : memref<8x128x128xbf16, #tpu.memory_space<vmem>>, vector<8x128x128xbf16>
    "tpu.trace_start"() <{level = 10 : i32, message = "bks,bsh->bkh"}> : () -> ()
    %cst_31 = arith.constant dense<0.000000e+00> : vector<8x2x128xf32>
    %51 = tpu.matmul %42, %50, %cst_31 {dimension_numbers = #tpu.dot_dimension_numbers<[2], [1], [1], [2], [0, 0, 0, 1, 1, 2], [0], [0]>} : vector<8x2x128xbf16>, vector<8x128x128xbf16>, vector<8x2x128xf32> -> vector<8x2x128xf32>
    "tpu.trace_stop"() : () -> ()
    %52 = arith.addf %49, %51 : vector<8x2x128xf32>
    %c0_32 = arith.constant 0 : index
    %c0_33 = arith.constant 0 : index
    %c0_34 = arith.constant 0 : index
    %53 = vector.load %arg9[%c0_32, %c0_33, %c0_34] : memref<8x128x128xbf16, #tpu.memory_space<vmem>>, vector<8x128x128xbf16>
    "tpu.trace_start"() <{level = 10 : i32, message = "bks,bsh->bkh"}> : () -> ()
    %cst_35 = arith.constant dense<0.000000e+00> : vector<8x2x128xf32>
    %54 = tpu.matmul %42, %53, %cst_35 {dimension_numbers = #tpu.dot_dimension_numbers<[2], [1], [1], [2], [0, 0, 0, 1, 1, 2], [0], [0]>} : vector<8x2x128xbf16>, vector<8x128x128xbf16>, vector<8x2x128xf32> -> vector<8x2x128xf32>
    "tpu.trace_stop"() : () -> ()
    %55 = arith.addf %52, %54 : vector<8x2x128xf32>
    %c0_36 = arith.constant 0 : index
    %c0_37 = arith.constant 0 : index
    %c0_38 = arith.constant 0 : index
    %56 = vector.load %arg11[%c0_36, %c0_37, %c0_38] : memref<8x2x128xf32, #tpu.memory_space<vmem>>, vector<8x2x128xf32>
    tpu.vector_store %arg11[%c0_36, %c0_37, %c0_38], %55 {strides = array<i32>} : memref<8x2x128xf32, #tpu.memory_space<vmem>>, vector<8x2x128xf32>,
    %c1_i32_39 = arith.constant 1 : i32
    %57 = arith.cmpi eq, %arg1, %c1_i32_39 : i32
    %58 = arith.extui %57 : i1 to i32
    %c0_i32_40 = arith.constant 0 : i32
    %59 = arith.cmpi ne, %58, %c0_i32_40 : i32
    scf.if %59 {
      %c0_41 = arith.constant 0 : index
      %c0_42 = arith.constant 0 : index
      %c0_43 = arith.constant 0 : index
      %60 = vector.load %arg12[%c0_41, %c0_42, %c0_43] : memref<8x2x1xf32, #tpu.memory_space<vmem>>, vector<8x2x1xf32>
      %cst_44 = arith.constant 1.000000e+00 : f32
      %61 = vector.broadcast %cst_44 : f32 to vector<8x2x1xf32>
      %62 = arith.maximumf %60, %61 : vector<8x2x1xf32>
      %c0_45 = arith.constant 0 : index
      %c0_46 = arith.constant 0 : index
      %c0_47 = arith.constant 0 : index
      %63 = vector.load %arg11[%c0_45, %c0_46, %c0_47] : memref<8x2x128xf32, #tpu.memory_space<vmem>>, vector<8x2x128xf32>
      %cst_48 = arith.constant 2.500000e-01 : f32
      %64 = vector.broadcast %cst_48 : f32 to vector<8x2x1xf32>
      %65 = arith.divf %64, %62 : vector<8x2x1xf32>
      %66 = vector.broadcast %65 : vector<8x2x1xf32> to vector<8x2x128xf32>
      %67 = arith.mulf %63, %66 : vector<8x2x128xf32>
      %68 = vector.extract_strided_slice %67 {offsets = [0, 0, 0], sizes = [8, 1, 128], strides = [1, 1, 1]} : vector<8x2x128xf32> to vector<8x1x128xf32>
      %69 = vector.shape_cast %68 : vector<8x1x128xf32> to vector<8x128xf32>
      %c0_49 = arith.constant 0 : index
      %c0_50 = arith.constant 0 : index
      %70 = vector.load %arg10[%c0_49, %c0_50] : memref<8x256xf32, #tpu.memory_space<vmem>>, vector<8x128xf32>
      tpu.vector_store %arg10[%c0_49, %c0_50], %69 {strides = array<i32>} : memref<8x256xf32, #tpu.memory_space<vmem>>, vector<8x128xf32>,
      %71 = vector.extract_strided_slice %67 {offsets = [0, 1, 0], sizes = [8, 1, 128], strides = [1, 1, 1]} : vector<8x2x128xf32> to vector<8x1x128xf32>
      %72 = vector.shape_cast %71 : vector<8x1x128xf32> to vector<8x128xf32>
      %c0_51 = arith.constant 0 : index
      %c128 = arith.constant 128 : index
      %73 = vector.load %arg10[%c0_51, %c128] : memref<8x256xf32, #tpu.memory_space<vmem>>, vector<8x128xf32>
      tpu.vector_store %arg10[%c0_51, %c128], %72 {strides = array<i32>} : memref<8x256xf32, #tpu.memory_space<vmem>>, vector<8x128xf32>,
    } else {
    }
    return
  }
  func.func @transform_0(%arg0: i32, %arg1: i32) -> (i32, i32) {
    %c0_i32 = arith.constant 0 : i32
    return %arg0, %arg1 : i32, i32
  }
  func.func @transform_1(%arg0: i32, %arg1: i32) -> (i32, i32) {
    %c0_i32 = arith.constant 0 : i32
    return %arg0, %arg1 : i32, i32
  }
  func.func @transform_2(%arg0: i32, %arg1: i32) -> (i32, i32) {
    %c0_i32 = arith.constant 0 : i32
    return %arg0, %arg1 : i32, i32
  }
  func.func @transform_3(%arg0: i32, %arg1: i32) -> (i32, i32) {
    %c0_i32 = arith.constant 0 : i32
    %c0_i32_0 = arith.constant 0 : i32
    return %arg0, %c0_i32 : i32, i32
  }
  func.func @transform_4(%arg0: i32, %arg1: i32) -> (i32, i32, i32) {
    %c0_i32 = arith.constant 0 : i32
    %c0_i32_0 = arith.constant 0 : i32
    return %arg0, %arg1, %c0_i32 : i32, i32, i32
  }
  func.func @transform_5(%arg0: i32, %arg1: i32) -> (i32, i32, i32) {
    %c0_i32 = arith.constant 0 : i32
    %c0_i32_0 = arith.constant 0 : i32
    return %arg0, %arg1, %c0_i32 : i32, i32, i32
  }
  func.func @transform_6(%arg0: i32, %arg1: i32) -> (i32, i32, i32) {
    %c0_i32 = arith.constant 0 : i32
    %c0_i32_0 = arith.constant 0 : i32
    return %arg0, %arg1, %c0_i32 : i32, i32, i32
  }
  func.func @transform_7(%arg0: i32, %arg1: i32) -> (i32, i32, i32) {
    %c0_i32 = arith.constant 0 : i32
    %c0_i32_0 = arith.constant 0 : i32
    return %arg0, %arg1, %c0_i32 : i32, i32, i32
  }
  func.func @transform_8(%arg0: i32, %arg1: i32) -> (i32, i32) {
    %c0_i32 = arith.constant 0 : i32
    %c0_i32_0 = arith.constant 0 : i32
    return %arg0, %c0_i32 : i32, i32
  }
}

</mosaic_0001>

<bundles_post_ra>
// kernel: tpu_custom_call.1
= control target key start
LH: loop header
LB: loop body
LE: loop exit
PB: predicated region body
PF: predicated region fallthrough
CT: control target
= control target key end

     0   :  { %s8416_s0 = inlined_call_operand.hbm [shape: s32[16,256], index: 0, kind: input, shape index: {}]   ;;  %s8417_s1 = inlined_call_operand.hbm [shape: s32[16,256], index: 1, kind: input, shape index: {}]   ;;  %s8418_s2 = inlined_call_operand.hbm [shape: s32[16,256], index: 2, kind: input, shape index: {}]   ;;  %s8419_s3 = inlined_call_operand.vmem [shape: s32[16,1], index: 3, kind: input, shape index: {}]   ;;  %s8420_s4 = inlined_call_operand.hbm [shape: bf16[16,256,128], index: 4, kind: input, shape index: {}]   ;;  %s8421_s5 = inlined_call_operand.hbm [shape: bf16[16,256,128], index: 5, kind: input, shape index: {}]   ;;  %s8422_s6 = inlined_call_operand.hbm [shape: bf16[16,256,128], index: 6, kind: input, shape index: {}]   ;;  %s8423_s7 = inlined_call_operand.hbm [shape: bf16[16,256,128], index: 7, kind: input, shape index: {}]   ;;  %s8424_s8 = inlined_call_operand.hbm [shape: f32[16,256], index: 8, kind: output, shape index: {}]  }
   0x1   :  { %8443 = sst [smem:[#allocation45_spill]] %s8417_s1 }
   0x2   :  { %8444 = sst [smem:[#allocation46_spill]] %s8419_s3 }
   0x3   :  { %8445 = sst [smem:[#allocation47_spill]] %s8424_s8 }
   0x4   :  { %13 = vsyncpa [#allocation5], 0 }
   0x5   :  { %15 = vsyncpa [#allocation5 + $0x1], 0 }
   0x6   :  { %16 = vsyncpa [#allocation8], 0 }
   0x7   :  { %18 = vsyncpa [#allocation8 + $0x1], 0 }
   0x8   :  { %19 = vsyncpa [#allocation11], 0 }
   0x9   :  { %21 = vsyncpa [#allocation11 + $0x1], 0 }
   0xa   :  { %22 = vsyncpa [#allocation14], 0 }
   0xb   :  { %24 = vsyncpa [#allocation14 + $0x1], 0 }
   0xc   :  { %25 = vsyncpa [#allocation6], 0 }
   0xd   :  { %27 = vsyncpa [#allocation6 + $0x1], 0  ;;  %s7009_s27 = smov 0   ;;  %s7011_s28 = smov 0  }
   0xe   :  { %s7013_s29 = smov 0   ;;  %s7015_s30 = smov 0  }
   0xf   :  { %s7017_s9 = smov 0   ;;  %s7019_s10 = smov 0  }
  0x10   :  { %s7021_s11 = smov 0   ;;  %s7023_s12 = smov 0  }
  0x11   :  { %s7025_s13 = smov 0   ;;  %s7027_s14 = smov 0  }
  0x12   :  { %s7029_s15 = smov 0  }
  0x13 LB: > { %8446 = sst [smem:[#allocation34_spill]] %s6886_s27  ;;  %s7063_s16 = sadd.s32 4294967295, %s6926_s15   ;;  %s6926_s15 = sphi %s7029_s15, %s33_s15   ;;  %s6922_s14 = sphi %s7027_s14, %s8564_s14   ;;  %s6918_s13 = sphi %s7025_s13, %s8563_s13   ;;  %s6914_s12 = sphi %s7023_s12, %s8562_s12   ;;  %s6910_s11 = sphi %s7021_s11, %s8561_s11   ;;  %s6906_s10 = sphi %s7019_s10, %s8560_s10   ;;  %s6902_s9 = sphi %s7017_s9, %s8559_s9   ;;  %s6898_s30 = sphi %s7015_s30, %s8558_s30   ;;  %s6894_s29 = sphi %s7013_s29, %s8551_s29   ;;  %s6890_s28 = sphi %s7011_s28, %s8557_s28   ;;  %s6886_s27 = sphi %s7009_s27, %s8556_s27  }
  0x14   : > { %8447 = sst [smem:[#allocation35_spill]] %s6894_s29  ;;  %s4841_s17 = sadd.s32 4294967294, %s6926_s15  }
  0x15   : > { %8448 = sst [smem:[#allocation36_spill]] %s6906_s10  ;;  %s42_s18 = sadd.s32 1, %s6918_s13 }
  0x16   : > { %8449 = sst [smem:[#allocation37_spill]] %s6910_s11  ;;  %s45_s19 = sadd.s32 1, %s6922_s14 }
  0x17   : > { %8450 = sst [smem:[#allocation38_spill]] %s6914_s12  ;;  %p43_p0 = scmp.ge.s32.totalorder %s42_s18, 2 }
  0x18   : > { %s54_s20 = sadd.s32 1, %s6906_s10  ;;  %p61_p1 = scmp.ne.s32.totalorder %s6906_s10, %s6902_s9 }
  0x19   : > { %p62_p2 = scmp.eq.s32.totalorder %s6926_s15, 0  ;;  %s8566_s18 = smov (%p43_p0, %s42_s18), 0 }
  0x1a   : > { %8451 = sst [smem:[#allocation39_spill]] %s8566_s18  ;;  %s8568_s19 = smov (!%p43_p0, %s45_s19), %s6922_s14 }
  0x1b   : > { %s50_s21 = ssub.s32 %s6918_s13, %s8566_s18  ;;  %p7077_p3 = por %p62_p2, %p61_p1 }
  0x1c   : > { %p47_p4 = scmp.ge.s32.totalorder %s8568_s19, 2  ;;  %p67_p5 = scmp.ne.s32.totalorder %s6902_s9, %s6898_s30 }
  0x1d   : > { %p68_p6 = scmp.eq.s32.totalorder %s7063_s16, 0  ;;  %s274_s23 = sadd.s32 1, %s6894_s29 }
  0x1e   : > { %s8570_s19 = smov (%p47_p4, %s8568_s19), 0  ;;  %p284_p8 = scmp.ne.s32.totalorder %s6894_s29, %s6890_s28 }
  0x1f   : > { %8453 = sst [smem:[#allocation40_spill]] %s8570_s19  ;;  %p7086_p7 = por %p68_p6, %p67_p5 }
  0x20   : > { %s49_s25 = ssub.s32 %s6922_s14, %s8570_s19  ;;  %p285_p9 = scmp.eq.s32.totalorder %s7063_s16, 3 }
  0x21   : > { %s8454_s24 = scalar_select %p7086_p7, 1, 0 }
  0x22   : > { %s51_s26 = sor.u32 %s50_s21, %s49_s25  ;;  %p272_p10 = scmp.eq.s32.totalorder %s49_s25, 0 }
  0x23   : > { %p52_p11 = scmp.eq.s32.totalorder %s51_s26, 0  ;;  %p7095_p12 = por %p285_p9, %p284_p8 }
  0x24   : > { %s7100_s30 = scalar_select %p272_p10, %s6894_s29, %s274_s23  }
  0x25   : > { %s8455_s18 = scalar_select %p7095_p12, 1, 0 }
  0x26   : > { %8457 = sst [smem:[#allocation42_spill]] %s7100_s30  ;;  %p290_p13 = scmp.ne.s32.totalorder %s6890_s28, %s6886_s27 }
  0x27   : > { %8456 = sst [smem:[#allocation41_spill]] %s8455_s18  ;;  %p291_p0 = scmp.eq.s32.totalorder %s4841_s17, 3 }
  0x28   : > { %s7103_s8 = scalar_select %p52_p11, %s6906_s10, %s54_s20  }
  0x29   : > { %p7107_p1 = por %p291_p0, %p290_p13  ;;  %p4843_p2 = scmp.ge.s32.totalorder %s6926_s15, 4 }
  0x2a   : > { %8458 = sst [smem:[#allocation43_spill]] %s7103_s8  ;;  %s7113_s21 = sand.u32 (!%p4843_p2), 1, %s6906_s10  }
  0x2b   : > { %s8459_s11 = scalar_select %p7107_p1, 1, 0 }
  0x2c   : > { %307 = sbr.rel (%p4843_p2) target bundleno = 176 (0xb0), region = 16  ;;  %s4845_s23 = sshll.u32 (!%p4843_p2), %s6922_s14, 1 }
  0x2d   : > { %8460 = sst [smem:[#allocation44_spill]] %s8459_s11  ;;  %s7117_s20 = sshll.u32 (!%p4843_p2), %s7113_s21, 3 }
  0x2e   : > { %s320_s17 = sadd.s32 (!%p4843_p2), %s6918_s13, %s4845_s23  ;;  %s7123_s26 = sand.u32 (!%p4843_p2), 1, %s6926_s15  }
  0x2f   : > { %s7120_s25 = sshll.u32 (!%p4843_p2), %s320_s17, 7  ;;  %s8461_s1 = sld [smem:[#allocation45_spill]] (!%p4843_p2) }
  0x30   : > { %s335_s10 = scalar_lea.vmem (!%p4843_p2), [#allocation7], %s7117_s20 }
  0x31   : > { %s344_s29 = sshll.u32 (!%p4843_p2), %s335_s10, 4  ;;  %s345_s29 = int_to_ptr.vmem [resolvable:$true] %s344_s29 }
  0x35   : > { %s7129_s30 = scalar_lea.hbm %s8461_s1, %s7120_s25  ;;  %s6712_s8 = scalar_lea.hbm %s8461_s1, 512 }
  0x36   : > { %s6708_s23 = scalar_lea.hbm %s7129_s30, 128  ;;  %p6713_p8 = scmp.lt.u32.totalorder %s7129_s30, %s8461_s1 }
  0x37   : > { %p6709_p4 = scmp.ne.s32.totalorder %s7129_s30, %s6708_s23  ;;  %p6714_p9 = scmp.lt.u32.totalorder %s6712_s8, %s6708_s23 }
  0x38   : > { %p6716_p11 = scmp.lt.u32.totalorder %s6708_s23, %s7129_s30 }
  0x39   : > { %p6710_p5 = pnand %p6709_p4, %p7077_p3  ;;  %p6715_p10 = por %p6714_p9, %p6713_p8 }
  0x3b   : > { %p6711_p6 = pneg %p6710_p5  ;;  %p6717_p13 = por %p6716_p11, %p6715_p10 }
  0x3d   : > { %p6718_p0 = pnand %p6717_p13, %p6711_p6 }
  0x3f   : > { %6721 = shalt.err (!%p6718_p0)
}
  0x40   : > { %s6722_s10 = scalar_lea.vmem %s345_s29, 128  ;;  %s6928_s11 = smov [#allocation7]  }
  0x41   : > { %p6723_p2 = scmp.ne.s32.totalorder %s345_s29, %s6722_s10  ;;  %s6726_s3 = sshll.u32 %s6928_s11, 4  ;;  %s6727_s3 = int_to_ptr.vmem [resolvable:$false] %s6726_s3 }
  0x42   : > { %s6728_s27 = scalar_lea.vmem %s6727_s3, 256  ;;  %p6729_p1 = scmp.lt.s32.totalorder %s345_s29, %s6727_s3 }
  0x43   : > { %p6724_p4 = pnand %p6723_p2, %p7077_p3  ;;  %p6730_p12 = scmp.lt.s32.totalorder %s6728_s27, %s6722_s10 }
  0x45   : > { %p6725_p5 = pneg %p6724_p4  ;;  %p6731_p7 = por %p6730_p12, %p6729_p1 }
  0x47   : > { %p6732_p8 = pnand %p6731_p7, %p6725_p5 }
  0x49   : > { %6735 = shalt.err (!%p6732_p8)
}
  0x4a   : > { %s8462_s18 = scalar_lea.sflag [#allocation8], %s7123_s26  ;;  %s7156_s17 = scalar_lea.hbm %s8416_s0, %s7120_s25 }
  0x4b   : > { %6265 = dma.hbm_to_vmem [thread:$0]  (%p7077_p3), %s7129_s30, 128, %s345_s29, %s8462_s18  }
  0x4c   : > { %s315_s3 = scalar_lea.vmem [#allocation4], %s7117_s20  ;;  %s7165_s27 = scalar_lea.hbm %s8418_s2, %s7120_s25 }
  0x4d   : > { %s324_s8 = sshll.u32 %s315_s3, 4  ;;  %s312_s1 = scalar_lea.sflag [#allocation5], %s7113_s21  ;;  %s7159_s8 = int_to_ptr.vmem [resolvable:$true] %s324_s8 }
  0x4e   : > { %s6736_s29 = scalar_lea.hbm %s7156_s17, 128  ;;  %s6740_s23 = scalar_lea.hbm %s8416_s0, 512 }
  0x4f   : > { %p6737_p7 = scmp.ne.s32.totalorder %s7156_s17, %s6736_s29  ;;  %p6741_p6 = scmp.lt.u32.totalorder %s7156_s17, %s8416_s0 }
  0x50   : > { %p6742_p9 = scmp.lt.u32.totalorder %s6740_s23, %s6736_s29  ;;  %p6744_p11 = scmp.lt.u32.totalorder %s6736_s29, %s7156_s17 }
  0x51   : > { %p6738_p12 = pnand %p6737_p7, %p7077_p3 }
  0x52   : > { %p6743_p10 = por %p6742_p9, %p6741_p6 }
  0x53   : > { %p6739_p1 = pneg %p6738_p12 }
  0x54   : > { %p6745_p13 = por %p6744_p11, %p6743_p10 }
  0x56   : > { %p6746_p0 = pnand %p6745_p13, %p6739_p1 }
  0x58   : > { %6749 = shalt.err (!%p6746_p0)
}
  0x59   : > { %s6750_s25 = scalar_lea.vmem %s7159_s8, 128  ;;  %s6929_s3 = smov [#allocation4]  }
  0x5a   : > { %p6751_p2 = scmp.ne.s32.totalorder %s7159_s8, %s6750_s25  ;;  %s6754_s19 = sshll.u32 %s6929_s3, 4  ;;  %s6755_s19 = int_to_ptr.vmem [resolvable:$false] %s6754_s19 }
  0x5b   : > { %s6756_s12 = scalar_lea.vmem %s6755_s19, 256  ;;  %p6757_p8 = scmp.lt.s32.totalorder %s7159_s8, %s6755_s19 }
  0x5c   : > { %p6752_p4 = pnand %p6751_p2, %p7077_p3  ;;  %p6758_p7 = scmp.lt.s32.totalorder %s6756_s12, %s6750_s25 }
  0x5e   : > { %p6753_p5 = pneg %p6752_p4  ;;  %p6759_p12 = por %p6758_p7, %p6757_p8 }
  0x60   : > { %p6760_p6 = pnand %p6759_p12, %p6753_p5 }
  0x62   : > { %6763 = shalt.err (!%p6760_p6)
}
  0x63   : > { %6264 = dma.hbm_to_vmem [thread:$0]  (%p7077_p3), %s7156_s17, 128, %s7159_s8, %s312_s1  }
  0x64   : > { %s355_s10 = scalar_lea.vmem [#allocation9], %s7117_s20  ;;  %s6764_s30 = scalar_lea.hbm %s7165_s27, 128 }
  0x65   : > { %s364_s29 = sshll.u32 %s355_s10, 4  ;;  %p6765_p1 = scmp.ne.s32.totalorder %s7165_s27, %s6764_s30  ;;  %s365_s29 = int_to_ptr.vmem [resolvable:$true] %s364_s29 }
  0x66   : > { %s6768_s11 = scalar_lea.hbm %s8418_s2, 512  ;;  %p6769_p11 = scmp.lt.u32.totalorder %s7165_s27, %s8418_s2 }
  0x67   : > { %p6766_p9 = pnand %p6765_p1, %p7077_p3  ;;  %p6770_p13 = scmp.lt.u32.totalorder %s6768_s11, %s6764_s30 }
  0x68   : > { %p6772_p2 = scmp.lt.u32.totalorder %s6764_s30, %s7165_s27 }
  0x69   : > { %p6767_p10 = pneg %p6766_p9  ;;  %p6771_p0 = por %p6770_p13, %p6769_p11 }
  0x6b   : > { %p6773_p4 = por %p6772_p2, %p6771_p0 }
  0x6d   : > { %p6774_p5 = pnand %p6773_p4, %p6767_p10 }
  0x6f   : > { %6777 = shalt.err (!%p6774_p5)
}
  0x70   : > { %s6778_s1 = scalar_lea.vmem %s365_s29, 128  ;;  %s6930_s20 = smov [#allocation9]  }
  0x71   : > { %p6779_p8 = scmp.ne.s32.totalorder %s365_s29, %s6778_s1  ;;  %s6782_s17 = sshll.u32 %s6930_s20, 4  ;;  %s6783_s17 = int_to_ptr.vmem [resolvable:$false] %s6782_s17 }
  0x72   : > { %s6784_s8 = scalar_lea.vmem %s6783_s17, 256  ;;  %p6785_p6 = scmp.lt.s32.totalorder %s365_s29, %s6783_s17 }
  0x73   : > { %p6780_p7 = pnand %p6779_p8, %p7077_p3  ;;  %p6786_p1 = scmp.lt.s32.totalorder %s6784_s8, %s6778_s1 }
  0x75   : > { %p6781_p12 = pneg %p6780_p7  ;;  %p6787_p9 = por %p6786_p1, %p6785_p6 }
  0x77   : > { %p6788_p11 = pnand %p6787_p9, %p6781_p12 }
  0x79   : > { %6791 = shalt.err (!%p6788_p11)
}
  0x7a   : > { %s8463_s19 = scalar_lea.sflag [#allocation8], %s7123_s26 }
  0x7b   : > { %6266 = dma.hbm_to_vmem [thread:$0]  (%p7077_p3), %s7165_s27, 128, %s365_s29, %s8463_s19  }
  0x7c   : > { %s7210_s12 = sshll.u32 %s7113_s21, 9  ;;  %s4855_s10 = sshll.u32 %s6918_s13, 4 }
  0x7d   : > { %s5227_s30 = sshll.u32 %s6922_s14, 8  ;;  %s382_s23 = scalar_lea.vmem [#allocation10], %s7210_s12 }
  0x7e   : > { %s389_s18 = sadd.s32 %s5227_s30, %s4855_s10  ;;  %s404_s11 = sshll.u32 %s382_s23, 4  ;;  %s405_s11 = int_to_ptr.vmem [resolvable:$true] %s404_s11 }
  0x7f   : > { %s7215_s25 = sshll.u32 %s389_s18, 6  ;;  %s6931_s27 = smov 2048  }
  0x80   : > { %6268 = sst [smem:[#allocation18]] (%p7077_p3), %s6931_s27  ;;  %s6932_s3 = smov 1024  }
  0x81   : > { %s6267_s29 = scalar_select %p7077_p3, [#allocation0], [#allocation25] }
  0x82   : > { %6269 = sst [smem:[#allocation18 + $0x1]] (%p7077_p3), %s6932_s3  ;;  %s6933_s1 = smov 16  }
  0x83   : > { %s396_s21 = sld [smem:[%s6267_s29]]   ;;  %s6934_s20 = smov 64  }
  0x84   : > { %6270 = sst [smem:[#allocation18 + $0x2]] (%p7077_p3), %s6933_s1  ;;  %s6935_s17 = smov 4  }
  0x85   : > { %6271 = sst [smem:[#allocation18 + $0x3]] (%p7077_p3), %s6934_s20  ;;  %s391_s10 = scalar_lea.hbm %s8420_s4, %s7215_s25 }
  0x86   : > { %6272 = sst [smem:[#allocation18 + $0x4]] (%p7077_p3), %s6934_s20  ;;  %s379_s23 = scalar_lea.sflag [#allocation11], %s7123_s26 }
  0x87   : > { %6273 = sst [smem:[#allocation18 + $0x5]] (%p7077_p3), %s6935_s17  ;;  %s6936_s27 = smov [#allocation17]  }
  0x89   : > { %s4858_s30 = sshll.u32 %s396_s21, 26 }
  0x8a   : > { %s4859_s18 = sadd.s32 134217728, %s4858_s30 }
  0x8b   : > { %6274 = dma.general (%p7077_p3), %s391_s10, 8192, %s405_s11, %s379_s23, %s6936_s27, [#allocation18], %s4859_s18, 0  }
  0x8c   : > { %s440_s1 = scalar_lea.hbm %s8421_s5, %s7215_s25  ;;  %s431_s21 = scalar_lea.vmem [#allocation12], %s7210_s12 }
  0x8d   : > { %s6275_s20 = scalar_select %p7077_p3, [#allocation0], [#allocation26] }
  0x8e   : > { %s453_s17 = sshll.u32 %s431_s21, 4  ;;  %s6937_s11 = smov 2048   ;;  %s454_s17 = int_to_ptr.vmem [resolvable:$true] %s453_s17 }
  0x8f   : > { %s445_s8 = sld [smem:[%s6275_s20]]   ;;  %s6938_s19 = smov 1024  }
  0x90   : > { %6276 = sst [smem:[#allocation20]] (%p7077_p3), %s6937_s11  ;;  %s6939_s10 = smov 16  }
  0x91   : > { %6277 = sst [smem:[#allocation20 + $0x1]] (%p7077_p3), %s6938_s19  ;;  %s6940_s30 = smov 64  }
  0x92   : > { %6278 = sst [smem:[#allocation20 + $0x2]] (%p7077_p3), %s6939_s10  ;;  %s6941_s27 = smov 4  }
  0x93   : > { %6279 = sst [smem:[#allocation20 + $0x3]] (%p7077_p3), %s6940_s30  ;;  %s6942_s3 = smov [#allocation19]  }
  0x94   : > { %6280 = sst [smem:[#allocation20 + $0x4]] (%p7077_p3), %s6940_s30 }
  0x95   : > { %s4865_s18 = sshll.u32 %s445_s8, 26  ;;  %6281 = sst [smem:[#allocation20 + $0x5]] (%p7077_p3), %s6941_s27 }
  0x96   : > { %s4866_s29 = sadd.s32 134217728, %s4865_s18 }
  0x97   : > { %6282 = dma.general (%p7077_p3), %s440_s1, 8192, %s454_s17, %s379_s23, %s6942_s3, [#allocation20], %s4866_s29, 0  }
  0x98   : > { %s489_s11 = scalar_lea.hbm %s8422_s6, %s7215_s25  ;;  %s480_s19 = scalar_lea.vmem [#allocation13], %s7210_s12 }
  0x99   : > { %s6283_s8 = scalar_select %p7077_p3, [#allocation0], [#allocation27] }
  0x9a   : > { %s502_s10 = sshll.u32 %s480_s19, 4  ;;  %s6943_s23 = smov 2048   ;;  %s503_s10 = int_to_ptr.vmem [resolvable:$true] %s502_s10 }
  0x9b   : > { %s494_s30 = sld [smem:[%s6283_s8]]   ;;  %s6944_s1 = smov 1024  }
  0x9c   : > { %6284 = sst [smem:[#allocation22]] (%p7077_p3), %s6943_s23  ;;  %s6945_s17 = smov 16  }
  0x9d   : > { %6285 = sst [smem:[#allocation22 + $0x1]] (%p7077_p3), %s6944_s1  ;;  %s6946_s18 = smov 64  }
  0x9e   : > { %6286 = sst [smem:[#allocation22 + $0x2]] (%p7077_p3), %s6945_s17  ;;  %s6947_s29 = smov 4  }
  0x9f   : > { %6287 = sst [smem:[#allocation22 + $0x3]] (%p7077_p3), %s6946_s18  ;;  %s477_s20 = scalar_lea.sflag [#allocation14], %s7123_s26 }
  0xa0   : > { %6288 = sst [smem:[#allocation22 + $0x4]] (%p7077_p3), %s6946_s18  ;;  %s6948_s21 = smov [#allocation21]  }
  0xa1   : > { %s4872_s27 = sshll.u32 %s494_s30, 26  ;;  %6289 = sst [smem:[#allocation22 + $0x5]] (%p7077_p3), %s6947_s29 }
  0xa2   : > { %s4873_s3 = sadd.s32 134217728, %s4872_s27 }
  0xa3   : > { %6290 = dma.general (%p7077_p3), %s489_s11, 8192, %s503_s10, %s477_s20, %s6948_s21, [#allocation22], %s4873_s3, 0  }
  0xa4   : > { %s538_s30 = scalar_lea.hbm %s8423_s7, %s7215_s25  ;;  %s529_s1 = scalar_lea.vmem [#allocation15], %s7210_s12 }
  0xa5   : > { %s6291_s23 = scalar_select %p7077_p3, [#allocation0], [#allocation28] }
  0xa6   : > { %s551_s26 = sshll.u32 %s529_s1, 4  ;;  %s6949_s11 = smov 2048   ;;  %s552_s26 = int_to_ptr.vmem [resolvable:$true] %s551_s26 }
  0xa7   : > { %s543_s17 = sld [smem:[%s6291_s23]]   ;;  %s6950_s10 = smov 1024  }
  0xa8   : > { %6292 = sst [smem:[#allocation24]] (%p7077_p3), %s6949_s11  ;;  %s6951_s18 = smov 16  }
  0xa9   : > { %6293 = sst [smem:[#allocation24 + $0x1]] (%p7077_p3), %s6950_s10  ;;  %s6952_s27 = smov 64  }
  0xaa   : > { %6294 = sst [smem:[#allocation24 + $0x2]] (%p7077_p3), %s6951_s18  ;;  %s6953_s12 = smov 4  }
  0xab   : > { %6295 = sst [smem:[#allocation24 + $0x3]] (%p7077_p3), %s6952_s27  ;;  %s6954_s3 = smov [#allocation23]  }
  0xac   : > { %6296 = sst [smem:[#allocation24 + $0x4]] (%p7077_p3), %s6952_s27 }
  0xad   : > { %s4879_s25 = sshll.u32 %s543_s17, 26  ;;  %6297 = sst [smem:[#allocation24 + $0x5]] (%p7077_p3), %s6953_s12 }
  0xae   : > { %s4880_s29 = sadd.s32 134217728, %s4879_s25 }
  0xaf   : > { %6298 = dma.general (%p7077_p3), %s538_s30, 8192, %s552_s26, %s477_s20, %s6954_s3, [#allocation24], %s4880_s29, 0  }
  0xb0 PF: > { %p4881_p10 = scmp.ge.s32.totalorder %s6926_s15, 1  ;;  %p572_p13 = scmp.lt.s32.totalorder %s6926_s15, 5 }
  0xb2   : > { %p573_p0 = pnand %p4881_p10, %p572_p13 }
  0xb3   : > { %s578_s21 = sand.u32 (!%p573_p0), 1, %s6902_s9   ;;  %p8464_p2 = scmp.ne.s32.totalorder (!%p573_p0), %s8454_s24, 0 }
  0xb4   : > { %576 = sbr.rel (%p573_p0) target bundleno = 1158 (0x486), region = 52  ;;  %s7305_s8 = sshll.u32 (!%p573_p0), %s578_s21, 3 }
  0xb5   : > { %s579_s19 = scalar_lea.sflag (!%p573_p0), [#allocation5], %s578_s21  ;;  %s582_s23 = scalar_lea.vmem (!%p573_p0), [#allocation4], %s7305_s8 }
  0xbb   : > { %6865 = dma.done.wait (%p8464_p2), %s579_s19, 128  }
  0xbc   : > { %6867 = vsyncadd (%p8464_p2), %s579_s19, 4294967168  ;;  %s587_s22 = sand.u32 1, %s7063_s16   ;;  %s591_s30 = scalar_lea.vmem [#allocation7], %s7305_s8 }
  0xbd   : > { %s588_s20 = scalar_lea.sflag [#allocation8], %s587_s22 }
  0xbe   : > { %6869 = dma.done.wait (%p8464_p2), %s588_s20, 256  }
  0xbf   : > { %6871 = vsyncadd (%p8464_p2), %s588_s20, 4294967040  ;;  %s4885_s1 = sshll.u32 %s578_s21, 9  ;;  %s600_s26 = scalar_lea.vmem [#allocation9], %s7305_s8 }
  0xc0   : > { %s606_s17 = scalar_lea.sflag [#allocation11], %s587_s22  ;;  %s7319_s11 = scalar_lea.vmem [#allocation10], %s4885_s1 }
  0xc1   : > { %6873 = dma.done.wait (%p8464_p2), %s606_s17, 16384  }
  0xc2   : > { %6875 = vsyncadd (%p8464_p2), %s606_s17, 4294950912  ;;  %s7325_s16 = scalar_lea.vmem [#allocation12], %s4885_s1  ;;  %s624_s10 = scalar_lea.sflag [#allocation14], %s587_s22 }
  0xc3   : > { %s7327_s18 = scalar_lea.vmem [#allocation13], %s4885_s1 }
  0xc4   : > { %6877 = dma.done.wait (%p8464_p2), %s624_s10, 16384  }
  0xc5   : > { %6879 = vsyncadd (%p8464_p2), %s624_s10, 4294950912  ;;  %s8465_s27 = sld [smem:[#allocation38_spill]]  ;;  %s700_s25 = sand.u32 1, %s6890_s28  }
  0xc6   : > { %s4889_s12 = sshll.u32 %s700_s25, 4  ;;  %s8466_s19 = sld [smem:[#allocation46_spill]] }
  0xc7   : > { %s7341_s20 = scalar_lea.vmem [#allocation15], %s4885_s1  ;;  %s7343_s17 = scalar_lea.vmem [#allocation16], %s4889_s12 }
  0xc8   : > { %s8467_s24 = sld [smem:[#allocation37_spill]] }
  0xcb   : > { %p703_p3 = scmp.lt.s32.totalorder %s8465_s27, 1 }
  0xcd   : > { %s8572_s27 = smov (!%p703_p3, %s8465_s27), 1 }
  0xce   : > { %s4890_s29 = sshll.u32 %s8572_s27, 3  ;;  %p4891_p4 = scmp.ne.s32.totalorder %s8467_s24, 0 }
  0xcf   : > { %s706_s22 = scalar_lea.vmem %s8466_s19, %s4890_s29  ;;  %vm728_vm0 = vcmask (!%p4891_p4), 1024   ;;  %v6955_v0 = vmov (!%p4891_p4), 0.0  }
  0xd0   : > { %719 = sbr.rel (%p4891_p4) target bundleno = 216 (0xd8), region = 84  ;;  %720 = vst [vmem:[#allocation2] sm:$0x3] (!%p4891_p4), %v6955_v0  ;;  %721 = vst [vmem:[#allocation2 + $0x2] sm:$0x3] (!%p4891_p4), %v6955_v0 }
  0xd1   : > { %722 = vst [vmem:[#allocation2 + $0x4] sm:$0x3] (!%p4891_p4), %v6955_v0  ;;  %723 = vst [vmem:[#allocation2 + $0x6] sm:$0x3] (!%p4891_p4), %v6955_v0 }
  0xd2   : > { %724 = vst [vmem:[#allocation2 + $0x8] sm:$0x3] (!%p4891_p4), %v6955_v0  ;;  %725 = vst [vmem:[#allocation2 + $0xa] sm:$0x3] (!%p4891_p4), %v6955_v0 }
  0xd3   : > { %726 = vst [vmem:[#allocation2 + $0xc] sm:$0x3] (!%p4891_p4), %v6955_v0  ;;  %727 = vst [vmem:[#allocation2 + $0xe] sm:$0x3] (!%p4891_p4), %v6955_v0 }
  0xd4   : > { %729 = vst.msk [vmem:[#allocation3] sm:$0x3] (!%p4891_p4), %vm728_vm0, %v6955_v0  ;;  %730 = vst.msk [vmem:[#allocation3 + $0x2] sm:$0x3] (!%p4891_p4), %vm728_vm0, %v6955_v0 }
  0xd5   : > { %731 = vst.msk [vmem:[#allocation3 + $0x4] sm:$0x3] (!%p4891_p4), %vm728_vm0, %v6955_v0  ;;  %732 = vst.msk [vmem:[#allocation3 + $0x6] sm:$0x3] (!%p4891_p4), %vm728_vm0, %v6955_v0 }
  0xd6   : > { %733 = vst.msk [vmem:[#allocation3 + $0x8] sm:$0x3] (!%p4891_p4), %vm728_vm0, %v6955_v0  ;;  %734 = vst.msk [vmem:[#allocation3 + $0xa] sm:$0x3] (!%p4891_p4), %vm728_vm0, %v6955_v0 }
  0xd7   : > { %735 = vst.msk [vmem:[#allocation3 + $0xc] sm:$0x3] %vm728_vm0, %v6955_v0  ;;  %736 = vst.msk [vmem:[#allocation3 + $0xe] sm:$0x3] %vm728_vm0, %v6955_v0 }
  0xd8 PF: > { %v740_v1 = vld [vmem:[%s706_s22] sm:$0xff]  ;;  %v6434_v2 = vld [vmem:[%s7319_s11] sm:$0xff]   ;;  %v6956_v3 = vmov 0   ;;  %v6957_v4 = vmov 0.0   ;;  %v6436_v6 = vld [vmem:[%s7319_s11 + $0x8] sm:$0xff]   ;;  %vm8438_vm1 = vmmov 0   ;;  %v741_v22 = vlaneseq }
  0xd9   : > { %6433 = vset.pattern.permute.xlu0 %v6956_v3  ;;  %5520 = vmatprep.subr.bf16.mxu0 %v6957_v4  ;;  %v6435_v5 = vld [vmem:[%s7319_s11 + $0x40] sm:$0xff]   ;;  %v6437_v7 = vld [vmem:[%s7319_s11 + $0x48] sm:$0xff]   ;;  %v6438_v8 = vld [vmem:[%s7319_s11 + $0x10] sm:$0xff]   ;;  %v6959_v20 = vmov 1966171168   ;;  %s8468_s1 = sld [smem:[#allocation37_spill]] }
  0xda   : > { %747 = vperm.xlu0 %6433, %v740_v1   ;;  %5521 = vmatpush3.bf16.msra.mxu0 %v6434_v2  ;;  %v6439_v9 = vld [vmem:[%s7319_s11 + $0x50] sm:$0xff]   ;;  %v6440_v10 = vld [vmem:[%s7319_s11 + $0x18] sm:$0xff]   ;;  %v6442_v12 = vld [vmem:[%s7319_s11 + $0x20] sm:$0xff]   ;;  %v763_v21 = vunpack.c.l.s4 %v6959_v20  ;;  %v7395_v24 = vshrl.u32 %v741_v22, 7  ;;  %v742_v33 = vand.u32 127, %v741_v22 }
  0xdb   : > { %5540 = vmatprep.subr.bf16.mxu1 %v6957_v4  ;;  %5522 = vmatprep.subr.bf16.mxu0 %v6957_v4  ;;  %v6441_v11 = vld [vmem:[%s7319_s11 + $0x58] sm:$0xff]   ;;  %v6443_v13 = vld [vmem:[%s7319_s11 + $0x60] sm:$0xff]   ;;  %v6444_v14 = vld [vmem:[%s7319_s11 + $0x28] sm:$0xff]  }
  0xdc   : > { %5541 = vmatpush3.bf16.msra.mxu1 %v6435_v5  ;;  %5536 = vmatprep.mubr.msk.bf16.mxu0 %vm8438_vm1, %v6957_v4  ;;  %v6445_v15 = vld [vmem:[%s7319_s11 + $0x68] sm:$0xff]   ;;  %v6446_v16 = vld [vmem:[%s7319_s11 + $0x30] sm:$0xff]   ;;  %v6448_v18 = vld [vmem:[%s7319_s11 + $0x38] sm:$0xff]   ;;  %v764_v25 = vunpack.c.0.s8 %v763_v21  ;;  %v7406_v36 = vsub.s32 0, %v7395_v24  ;;  %vm758_vm6 = vcmp.eq.s32.totalorder %v7395_v24, 1 }
  0xdd   : > { %5542 = vmatprep.subr.bf16.mxu1 %v6957_v4  ;;  %5556 = vmatprep.mubr.msk.bf16.mxu1 %vm8438_vm1, %v6957_v4  ;;  %v6447_v17 = vld [vmem:[%s7319_s11 + $0x70] sm:$0xff]   ;;  %v6449_v19 = vld [vmem:[%s7319_s11 + $0x78] sm:$0xff]   ;;  %v738_v47 = vld [vmem:[%s591_s30] sm:$0xff] }
  0xde   : > { %5523 = vmatpush3.bf16.msra.mxu0 %v6436_v6  ;;  %v739_v23 = vld [vmem:[%s600_s26] sm:$0xff]  ;;  %v7398_v26 = vsub.s32 %v764_v25, %v7395_v24  ;;  %vm754_vm14 = vcmp.eq.s32.totalorder %v738_v47, 1  ;;  %v6461_v21 = vld [vmem:[%s7319_s11 + $0xe8] sm:$0xff]  }
  0xdf   : > { %5524 = vmatprep.subr.bf16.mxu0 %v6957_v4  ;;  %vm759_vm2 = vcmp.ne.s32.totalorder %v739_v23, 0  ;;  %v737_v37 = vld [vmem:[%s582_s23] sm:$0xff]  ;;  %s4892_s26 = sshll.u32 %s8468_s1, 7  ;;  %p5221_p5 = scmp.ne.s32.totalorder %s8468_s1, 1 }
  0xe0   : > { %5543 = vmatpush3.bf16.msra.mxu1 %v6437_v7  ;;  %v760_v27 = vsel %vm759_vm2, 1, %v6956_v3  ;;  %vm750_vm7 = vcmp.ne.s32.totalorder %v737_v37, 101  ;;  %v744_v46 = vstv %s4892_s26  ;;  %vm752_vm12 = vcmp.ne.s32.totalorder %v737_v37, 102  ;;  %v6478_v47 = vld [vmem:[%s7319_s11 + $0x130] sm:$0xff]  }
  0xe1   : > { %5544 = vmatprep.subr.bf16.mxu1 %v6957_v4  ;;  %v768_v28 = vrot.slane %v760_v27, %v7398_v26  ;;  %v761_v31 = vcombine.high %v760_v27, %v760_v27  ;;  %v745_v50 = vadd.s32 %v744_v46, %v742_v33  ;;  %v6452_v46 = vld [vmem:[%s7319_s11 + $0x88] sm:$0xff]  }
  0xe2   : > { %5525 = vmatpush3.bf16.msra.mxu0 %v6438_v8 }
  0xe3   : > { %5526 = vmatprep.subr.bf16.mxu0 %v6957_v4  ;;  %v776_v29 = vcombine.high %v768_v28, %v768_v28  ;;  %v784_v30 = vrot.slane %v768_v28, %v7398_v26  ;;  %v775_v35 = vrot.slane %v761_v31, %v7398_v26  ;;  %v6450_v28 = vld [vmem:[%s7319_s11 + $0x80] sm:$0xff]  }
  0xe4   : > { %5545 = vmatpush3.bf16.msra.mxu1 %v6439_v9  ;;  %v6466_v31 = vld [vmem:[%s7319_s11 + $0x100] sm:$0xff]  }
  0xe5   : > { %5546 = vmatprep.subr.bf16.mxu1 %v6957_v4  ;;  %v798_v32 = vrot.slane %v776_v29, %v7398_v26  ;;  %vm810_vm3 = vcmp.ne.s32.totalorder %v784_v30, 0  ;;  %v806_v34 = vcombine.high %v784_v30, %v784_v30  ;;  %v791_v40 = vrot.slane %v775_v35, %v7398_v26 }
  0xe6   : > { %5527 = vmatpush3.bf16.msra.mxu0 %v6440_v10  ;;  %v818_v38 = vsel %vm810_vm3, 1, %v6956_v3  ;;  %v777_v45 = vcombine.high %v775_v35, %v775_v35 }
  0xe7   : > { %5528 = vmatprep.subr.bf16.mxu0 %v6957_v4  ;;  %vm811_vm4 = vcmp.ne.s32.totalorder %v798_v32, 0  ;;  %vm812_vm5 = vcmp.ne.s32.totalorder %v806_v34, 0  ;;  %v829_v41 = vrot.slane %v818_v38, %v7406_v36  ;;  %v808_v42 = vcombine.high %v798_v32, %v798_v32  ;;  %v6451_v34 = vld [vmem:[%s7319_s11 + $0xc0] sm:$0xff]   ;;  %v6470_v38 = vld [vmem:[%s7319_s11 + $0x110] sm:$0xff]  }
  0xe8   : > { %5547 = vmatpush3.bf16.msra.mxu1 %v6441_v11  ;;  %v819_v39 = vsel %vm811_vm4, 1, %v6956_v3  ;;  %v820_v44 = vsel %vm812_vm5, 1, %v6956_v3  ;;  %vm814_vm8 = vcmp.ne.s32.totalorder %v791_v40, 0  ;;  %v805_v49 = vrot.slane %v777_v45, %v7398_v26  ;;  %v6457_v11 = vld [vmem:[%s7319_s11 + $0xd8] sm:$0xff]  }
  0xe9   : > { %5548 = vmatprep.subr.bf16.mxu1 %v6957_v4  ;;  %v833_v43 = vrot.slane %v819_v39, %v7406_v36  ;;  %vm858_vm9 = vcmp.eq.s32.totalorder %v829_v41, 1  ;;  %vm813_vm10 = vcmp.ne.s32.totalorder %v808_v42, 0  ;;  %v822_v48 = vsel %vm814_vm8, 1, %v6956_v3  ;;  %v6474_v42 = vld [vmem:[%s7319_s11 + $0x120] sm:$0xff]  }
  0xea   : > { %5529 = vmatpush3.bf16.msra.mxu0 %v6442_v12  ;;  %vm7424_vm13 = vmxor %vm758_vm6, %vm858_vm9  ;;  %v821_v52 = vsel %vm813_vm10, 1, %v6956_v3  ;;  %v837_v53 = vrot.slane %v820_v44, %v7406_v36  ;;  %v807_v54 = vcombine.high %v791_v40, %v791_v40  ;;  %v845_v57 = vrot.slane %v822_v48, %v7406_v36  ;;  %v6646_v40 = vld [vmem:[%s7341_s20 + $0x90] sm:$0xff]  }
  0xeb   : > { %5530 = vmatprep.subr.bf16.mxu0 %v6957_v4  ;;  %vm859_vm11 = vcmp.eq.s32.totalorder %v833_v43, 1  ;;  %vm815_vm0 = vcmp.ne.s32.totalorder %v805_v49, 0  ;;  %v809_v58 = vcombine.high %v805_v49, %v805_v49  ;;  %v841_v59 = vrot.slane %v821_v52, %v7406_v36 }
  0xec   : > { %5549 = vmatpush3.bf16.msra.mxu1 %v6443_v13  ;;  %vm7432_vm15 = vmxor %vm758_vm6, %vm859_vm11  ;;  %vm860_vm5 = vcmp.eq.s32.totalorder %v837_v53, 1  ;;  %vm816_vm8 = vcmp.ne.s32.totalorder %v807_v54, 0  ;;  %vm7439_vm10 = vcmp.eq.s32.totalorder %v845_v57, 1  ;;  %v823_v61 = vsel %vm815_vm0, 1, %v6956_v3  ;;  %v6453_v57 = vld [vmem:[%s7319_s11 + $0xc8] sm:$0xff]   ;;  %v6483_v54 = vld [vmem:[%s7319_s11 + $0x1c0] sm:$0xff]  }
  0xed   : > { %5550 = vmatprep.subr.bf16.mxu1 %v6957_v4  ;;  %vm8440_vm11 = vmmov 1   ;;  %vm7462_vm0 = vmxor %vm758_vm6, %vm860_vm5  ;;  %v7467_v6 = vsel %vm816_vm8, 1, %v6956_v3  ;;  %v849_v7 = vrot.slane %v823_v61, %v7406_v36  ;;  %v6961_v44 = vmov 1.0|1.0   ;;  %v6489_v61 = vld [vmem:[%s7319_s11 + $0x1d8] sm:$0xff]  }
  0xee   : > { %5531 = vmatpush3.bf16.msra.mxu0 %v6444_v14  ;;  %vm7448_vm1 = vmxor %vm7424_vm13, %vm8440_vm11  ;;  %vm861_vm13 = vcmp.eq.s32.totalorder %v841_v59, 1  ;;  %v853_v13 = vrot.slane %v7467_v6, %v7406_v36  ;;  %v6487_v59 = vld [vmem:[%s7319_s11 + $0x1d0] sm:$0xff]   ;;  %v6497_v6 = vld [vmem:[%s7319_s11 + $0x1f8] sm:$0xff]  }
  0xef   : > { %5532 = vmatprep.subr.bf16.mxu0 %v6957_v4  ;;  %vm7501_vm5 = vcmp.eq.s32.totalorder %v849_v7, 1  ;;  %v6456_v7 = vld [vmem:[%s7319_s11 + $0x98] sm:$0xff]  }
  0xf0   : > { %5551 = vmatpush3.bf16.msra.mxu1 %v6445_v15 }
  0xf1   : > { %5552 = vmatprep.subr.bf16.mxu1 %v6957_v4 }
  0xf2   : > { %5533 = vmatpush3.bf16.msra.mxu0 %v6446_v16 }
  0xf3   : > { %5534 = vmatprep.subr.bf16.mxu0 %v6957_v4 }
  0xf4   : > { %5553 = vmatpush3.bf16.msra.mxu1 %v6447_v17 }
  0xf5   : > { %5554 = vmatprep.subr.bf16.mxu1 %v6957_v4 }
  0xf6   : > { %5535 = vmatpush3.bf16.msra.mxu0 %v6448_v18 }
  0xf7   : > { %5560 = vmatprep.subr.bf16.mxu0 %v6957_v4 }
  0xf8   : > { %5555 = vmatpush3.bf16.msra.mxu1 %v6449_v19 }
  0xf9   : > { %5580 = vmatprep.subr.bf16.mxu1 %v6957_v4 }
 0x159   : > { %v748_v55 = vpop.permute.xlu0 %747 }
 0x15a   : > { %vm749_vm2 = vcmp.lt.s32.totalorder %v745_v50, %v748_v55  ;;  %v6484_v55 = vld [vmem:[%s7319_s11 + $0x188] sm:$0xff]   ;;  %v6647_v50 = vld [vmem:[%s7341_s20 + $0xd0] sm:$0xff]  }
 0x15b   : > { %vm751_vm3 = vmand %vm749_vm2, %vm750_vm7  ;;  %vm817_vm7 = vcmp.ne.s32.totalorder %v809_v58, 0 }
 0x15c   : > { %vm753_vm4 = vmand %vm751_vm3, %vm752_vm12  ;;  %vm8442_vm12 = vcmask 1041408   ;;  %v7481_v12 = vsel %vm817_vm7, 1, %v6956_v3 }
 0x15d   : > { %vm755_vm9 = vmand %vm753_vm4, %vm754_vm14  ;;  %v857_v22 = vrot.slane %v7481_v12, %v7406_v36  ;;  %v6503_v12 = vld [vmem:[%s7325_s16 + $0x50] sm:$0xff]  }
 0x15e   : > { %v882_v62 = vsel %vm755_vm9, 1, %v6956_v3  ;;  %vm7456_vm14 = vmxor %vm7432_vm15, %vm8440_vm11 }
 0x15f   : > { %v883_v0 = vcombine.high %v882_v62, %v882_v62  ;;  %v890_v1 = vrot.slane %v882_v62, %v7398_v26  ;;  %vm7476_vm15 = vmxor %vm758_vm6, %vm7439_vm10  ;;  %v6490_v62 = vld [vmem:[%s7319_s11 + $0x1a0] sm:$0xff]  }
 0x160   : > { %vm7488_vm3 = vmxor %vm758_vm6, %vm861_vm13 }
 0x161   : > { %v897_v8 = vrot.slane %v883_v0, %v7398_v26  ;;  %v898_v9 = vcombine.high %v890_v1, %v890_v1  ;;  %v906_v10 = vrot.slane %v890_v1, %v7398_v26  ;;  %vm7496_vm4 = vmxor %vm7462_vm0, %vm8440_vm11  ;;  %v6454_v1 = vld [vmem:[%s7319_s11 + $0x90] sm:$0xff]  }
 0x162   : > { %vm7511_vm10 = vmxor %vm7476_vm15, %vm8440_vm11 }
 0x163   : > { %v899_v14 = vcombine.high %v897_v8, %v897_v8  ;;  %v920_v15 = vrot.slane %v898_v9, %v7398_v26  ;;  %vm932_vm2 = vcmp.ne.s32.totalorder %v906_v10, 0  ;;  %v928_v16 = vcombine.high %v906_v10, %v906_v10  ;;  %vm7521_vm0 = vmxor %vm7488_vm3, %vm8440_vm11  ;;  %v6501_v10 = vld [vmem:[%s7325_s16 + $0x48] sm:$0xff]  }
 0x164   : > { %v940_v18 = vsel %vm932_vm2, 1, %v6956_v3  ;;  %v913_v20 = vrot.slane %v897_v8, %v7398_v26  ;;  %vm7534_vm15 = vmxor %vm758_vm6, %vm7501_vm5  ;;  %v6499_v8 = vld [vmem:[%s7325_s16 + $0x40] sm:$0xff]  }
 0x165   : > { %v951_v23 = vrot.slane %v940_v18, %v7406_v36  ;;  %vm933_vm8 = vcmp.ne.s32.totalorder %v920_v15, 0  ;;  %vm934_vm9 = vcmp.ne.s32.totalorder %v928_v16, 0  ;;  %v930_v27 = vcombine.high %v920_v15, %v920_v15  ;;  %v6459_v15 = vld [vmem:[%s7319_s11 + $0xe0] sm:$0xff]   ;;  %v6509_v18 = vld [vmem:[%s7325_s16 + $0x68] sm:$0xff]  }
 0x166   : > { %v941_v29 = vsel %vm933_vm8, 1, %v6956_v3  ;;  %v942_v30 = vsel %vm934_vm9, 1, %v6956_v3  ;;  %vm936_vm7 = vcmp.ne.s32.totalorder %v913_v20, 0  ;;  %v927_v32 = vrot.slane %v899_v14, %v7398_v26  ;;  %v6458_v14 = vld [vmem:[%s7319_s11 + $0xa0] sm:$0xff]  }
 0x167   : > { %vm980_vm13 = vcmp.eq.s32.totalorder %v951_v23, 1  ;;  %v955_v33 = vrot.slane %v941_v29, %v7406_v36  ;;  %v959_v35 = vrot.slane %v942_v30, %v7406_v36  ;;  %v944_v37 = vsel %vm936_vm7, 1, %v6956_v3  ;;  %v6462_v23 = vld [vmem:[%s7319_s11 + $0xb0] sm:$0xff]   ;;  %v6464_v29 = vld [vmem:[%s7319_s11 + $0xb8] sm:$0xff]  }
 0x168   : > { %vm988_vm2 = vmand %vm7448_vm1, %vm980_vm13  ;;  %v967_v26 = vrot.slane %v944_v37, %v7406_v36  ;;  %vm935_vm3 = vcmp.ne.s32.totalorder %v930_v27, 0  ;;  %vm937_vm8 = vcmp.ne.s32.totalorder %v927_v32, 0  ;;  %v929_v39 = vcombine.high %v913_v20, %v913_v20  ;;  %v6460_v20 = vld [vmem:[%s7319_s11 + $0xa8] sm:$0xff]   ;;  %v6463_v27 = vld [vmem:[%s7319_s11 + $0xf0] sm:$0xff]  }
 0x169   : > { %vm7541_vm9 = vmpackc.low %vm988_vm2, %vm988_vm2  ;;  %v4893_v41 = vsel %vm988_vm2, 1.0, %v6957_v4  ;;  %vm981_vm7 = vcmp.eq.s32.totalorder %v955_v33, 1  ;;  %vm7546_vm11 = vcmp.eq.s32.totalorder %v959_v35, 1  ;;  %v943_v43 = vsel %vm935_vm3, 1, %v6956_v3  ;;  %v6465_v30 = vld [vmem:[%s7319_s11 + $0xf8] sm:$0xff]   ;;  %v6467_v33 = vld [vmem:[%s7319_s11 + $0x140] sm:$0xff]  }
 0x16a   : > { %5537 = vmatmul.mubr.msk.bf16.vlgmr.msra.gmra.mrb[0].mxu0 %vm7541_vm9, %v6961_v44  ;;  %v1021_v45 = vsel %vm8442_vm12, %v4893_v41, 0.0  ;;  %vm989_vm1 = vmand %vm7456_vm14, %vm981_vm7  ;;  %vm7558_vm5 = vcmp.eq.s32.totalorder %v967_v26, 1  ;;  %v963_v48 = vrot.slane %v943_v43, %v7406_v36  ;;  %v945_v49 = vsel %vm937_vm8, 1, %v6956_v3  ;;  %v6469_v37 = vld [vmem:[%s7319_s11 + $0x148] sm:$0xff]   ;;  %v6471_v26 = vld [vmem:[%s7319_s11 + $0x150] sm:$0xff]  }
 0x16b   : > { %5561 = vmatpush3.bf16.msra.mxu0 %v6450_v28  ;;  %1022 = vadd.xlane.f32.xlu0 %v1021_v45  ;;  %vm7564_vm13 = vmpackc.low %vm989_vm1, %vm989_vm1  ;;  %v4894_v51 = vsel %vm989_vm1, 1.0, %v6957_v4  ;;  %vm938_vm2 = vcmp.ne.s32.totalorder %v929_v39, 0  ;;  %v931_v52 = vcombine.high %v927_v32, %v927_v32  ;;  %vm7582_vm3 = vcmp.eq.s32.totalorder %v853_v13, 1  ;;  %v6472_v39 = vld [vmem:[%s7319_s11 + $0x118] sm:$0xff]   ;;  %v6475_v43 = vld [vmem:[%s7319_s11 + $0x160] sm:$0xff]  }
 0x16c   : > { %5557 = vmatmul.mubr.msk.bf16.vlgmr.msra.gmra.mrb[0].mxu1 %vm7564_vm13, %v6961_v44  ;;  %5562 = vmatprep.subr.bf16.mxu0 %v6957_v4  ;;  %v1024_v53 = vsel %vm8442_vm12, %v4894_v51, 0.0  ;;  %vm7578_vm14 = vmand %vm7496_vm4, %vm7546_vm11  ;;  %v946_v56 = vsel %vm938_vm2, 1, %v6956_v3  ;;  %vm8507_vm8 = vmmov 1   ;;  %v971_v60 = vrot.slane %v945_v49, %v7406_v36  ;;  %v6473_v41 = vld [vmem:[%s7319_s11 + $0x158] sm:$0xff]   ;;  %v6476_v45 = vld [vmem:[%s7319_s11 + $0x128] sm:$0xff]  }
 0x16d   : > { %5581 = vmatpush3.bf16.msra.mxu1 %v6451_v34  ;;  %1025 = vadd.xlane.f32.xlu1 %v1024_v53  ;;  %v4895_v58 = vsel %vm7578_vm14, 1.0, %v6957_v4  ;;  %vm7594_vm11 = vmxor %vm7534_vm15, %vm8507_vm8  ;;  %vm865_vm4 = vcmp.eq.s32.totalorder %v857_v22, 1  ;;  %vm939_vm7 = vcmp.ne.s32.totalorder %v931_v52, 0  ;;  %vm7608_vm2 = vcmp.eq.s32.totalorder %v963_v48, 1  ;;  %v6468_v34 = vld [vmem:[%s7319_s11 + $0x108] sm:$0xff]   ;;  %v6479_v48 = vld [vmem:[%s7319_s11 + $0x170] sm:$0xff]  }
 0x16e   : > { %5582 = vmatprep.subr.bf16.mxu1 %v6957_v4  ;;  %vm7604_vm1 = vmand %vm7511_vm10, %vm7558_vm5  ;;  %v975_v63 = vrot.slane %v946_v56, %v7406_v36  ;;  %v947_v0 = vsel %vm939_vm7, 1, %v6956_v3  ;;  %vm8514_vm15 = vmmov 0   ;;  %v1027_v2 = vsel %vm8442_vm12, %v4895_v58, 0.0  ;;  %v6455_v3 = vld [vmem:[%s7319_s11 + $0xd0] sm:$0xff]   ;;  %v6480_v49 = vld [vmem:[%s7319_s11 + $0x138] sm:$0xff]  }
 0x16f   : > { %5576 = vmatprep.mubr.msk.bf16.mxu0 %vm8514_vm15, %v6957_v4  ;;  %5563 = vmatpush3.bf16.msra.mxu0 %v6452_v46  ;;  %vm872_vm10 = vmxor %vm758_vm6, %vm7582_vm3  ;;  %v4897_v5 = vsel %vm7604_vm1, 1.0, %v6957_v4  ;;  %vm985_vm7 = vcmp.eq.s32.totalorder %v971_v60, 1  ;;  %v979_v24 = vrot.slane %v947_v0, %v7406_v36  ;;  %v6477_v46 = vld [vmem:[%s7319_s11 + $0x168] sm:$0xff]   ;;  %v6481_v51 = vld [vmem:[%s7319_s11 + $0x178] sm:$0xff]  }
 0x170   : > { %5596 = vmatprep.mubr.msk.bf16.mxu1 %vm8514_vm15, %v6957_v4  ;;  %5564 = vmatprep.subr.bf16.mxu0 %v6957_v4  ;;  %vm873_vm5 = vmxor %vm758_vm6, %vm865_vm4  ;;  %vm986_vm4 = vcmp.eq.s32.totalorder %v975_v63, 1  ;;  %v6482_v52 = vld [vmem:[%s7319_s11 + $0x180] sm:$0xff]   ;;  %v6486_v58 = vld [vmem:[%s7319_s11 + $0x190] sm:$0xff]  }
 0x171   : > { %5583 = vmatpush3.bf16.msra.mxu1 %v6453_v57  ;;  %1028 = vadd.xlane.f32.xlu1 %v1027_v2  ;;  %vm7635_vm3 = vmand %vm7521_vm0, %vm7608_vm2  ;;  %vm8519_vm0 = vcmask 1041408   ;;  %v6485_v57 = vld [vmem:[%s7319_s11 + $0x1c8] sm:$0xff]   ;;  %v6488_v60 = vld [vmem:[%s7319_s11 + $0x198] sm:$0xff]  }
 0x172   : > { %5584 = vmatprep.subr.bf16.mxu1 %v6957_v4  ;;  %vm880_vm6 = vmxor %vm872_vm10, %vm8507_vm8  ;;  %v1033_v9 = vsel %vm8519_vm0, %v4897_v5, 0.0  ;;  %v4896_v36 = vsel %vm7635_vm3, 1.0, %v6957_v4  ;;  %vm987_vm10 = vcmp.eq.s32.totalorder %v979_v24, 1  ;;  %v6491_v63 = vld [vmem:[%s7319_s11 + $0x1e0] sm:$0xff]   ;;  %v6492_v0 = vld [vmem:[%s7319_s11 + $0x1a8] sm:$0xff]  }
 0x173   : > { %5565 = vmatpush3.bf16.msra.mxu0 %v6454_v1  ;;  %vm7644_vm12 = vmxor %vm873_vm5, %vm8507_vm8  ;;  %v6493_v1 = vld [vmem:[%s7319_s11 + $0x1e8] sm:$0xff]   ;;  %v6494_v2 = vld [vmem:[%s7319_s11 + $0x1b0] sm:$0xff]  }
 0x174   : > { %5566 = vmatprep.subr.bf16.mxu0 %v6957_v4  ;;  %vm7655_vm2 = vmand %vm7594_vm11, %vm985_vm7  ;;  %v6496_v5 = vld [vmem:[%s7319_s11 + $0x1b8] sm:$0xff]   ;;  %v6498_v24 = vld [vmem:[%s7325_s16] sm:$0xff]  }
 0x175   : > { %5585 = vmatpush3.bf16.msra.mxu1 %v6455_v3  ;;  %1034 = vadd.xlane.f32.xlu1 %v1033_v9  ;;  %vm7660_vm8 = vmand %vm880_vm6, %vm986_vm4  ;;  %v4898_v16 = vsel %vm7655_vm2, 1.0, %v6957_v4  ;;  %v6495_v3 = vld [vmem:[%s7319_s11 + $0x1f0] sm:$0xff]  }
 0x176   : > { %5586 = vmatprep.subr.bf16.mxu1 %v6957_v4  ;;  %vm8524_vm5 = vmmov %vm8519_vm0  ;;  %v4899_v17 = vsel %vm7660_vm8, 1.0, %v6957_v4  ;;  %v6662_v32 = vld [vmem:[%s7341_s20 + $0x110] sm:$0xff]  }
 0x177   : > { %5567 = vmatpush3.bf16.msra.mxu0 %v6456_v7  ;;  %v1030_v13 = vsel %vm8524_vm5, %v4896_v36, 0.0  ;;  %vm7677_vm11 = vmand %vm7644_vm12, %vm987_vm10  ;;  %v6500_v36 = vld [vmem:[%s7325_s16 + $0x8] sm:$0xff]   ;;  %v6663_v35 = vld [vmem:[%s7341_s20 + $0x150] sm:$0xff]   ;;  %vm4556_vm10 = vcmask (!%p5221_p5), 1044484   ;;  %vm4559_vm5 = vcmask (!%p5221_p5), 1045509  }
 0x178   : > { %5568 = vmatprep.subr.bf16.mxu0 %v6957_v4  ;;  %vm8527_vm7 = vmmov %vm8519_vm0  ;;  %v4900_v25 = vsel %vm7677_vm11, 1.0, %v6957_v4  ;;  %v6678_v53 = vld [vmem:[%s7341_s20 + $0x190] sm:$0xff]  }
 0x179   : > { %5587 = vmatpush3.bf16.msra.mxu1 %v6457_v11  ;;  %1031 = vadd.xlane.f32.xlu1 %v1030_v13  ;;  %v1036_v19 = vsel %vm8527_vm7, %v4898_v16, 0.0  ;;  %vm8528_vm6 = vmmov %vm8519_vm0  ;;  %v6502_v11 = vld [vmem:[%s7325_s16 + $0x10] sm:$0xff]   ;;  %v6504_v13 = vld [vmem:[%s7325_s16 + $0x18] sm:$0xff]   ;;  %vm4565_vm7 = vcmask (!%p5221_p5), 1047559  }
 0x17a   : > { %5588 = vmatprep.subr.bf16.mxu1 %v6957_v4  ;;  %v1039_v22 = vsel %vm8528_vm6, %v4899_v17, 0.0  ;;  %vm8529_vm12 = vmmov %vm8519_vm0  ;;  %v6507_v16 = vld [vmem:[%s7325_s16 + $0x60] sm:$0xff]   ;;  %v6508_v17 = vld [vmem:[%s7325_s16 + $0x28] sm:$0xff]  }
 0x17b   : > { %5569 = vmatpush3.bf16.msra.mxu0 %v6458_v14  ;;  %v1042_v28 = vsel %vm8529_vm12, %v4900_v25, 0.0  ;;  %vm7705_vm4 = vmpackc.low %vm7578_vm14, %vm7578_vm14  ;;  %v6505_v14 = vld [vmem:[%s7325_s16 + $0x58] sm:$0xff]   ;;  %v6515_v25 = vld [vmem:[%s7325_s16 + $0xc0] sm:$0xff]  }
 0x17c   : > { %5570 = vmatprep.subr.bf16.mxu0 %v6957_v4  ;;  %vm7718_vm0 = vmpackc.low %vm7635_vm3, %vm7635_vm3  ;;  %v6679_v56 = vld [vmem:[%s7341_s20 + $0x1d0] sm:$0xff]  }
 0x17d   : > { %5589 = vmatpush3.bf16.msra.mxu1 %v6459_v15  ;;  %1037 = vadd.xlane.f32.xlu1 %v1036_v19  ;;  %vm7760_vm14 = vmpackc.low %vm7604_vm1, %vm7604_vm1  ;;  %v6506_v15 = vld [vmem:[%s7325_s16 + $0x20] sm:$0xff]   ;;  %v6510_v19 = vld [vmem:[%s7325_s16 + $0x30] sm:$0xff]  }
 0x17e   : > { %5590 = vmatprep.subr.bf16.mxu1 %v6957_v4  ;;  %vm7770_vm3 = vmpackc.low %vm7655_vm2, %vm7655_vm2  ;;  %v1072_v7 = vld [vmem:[#allocation2 + $0x4] sm:$0x3] }
 0x17f   : > { %5571 = vmatpush3.bf16.msra.mxu0 %v6460_v20  ;;  %vm7817_vm1 = vmpackc.low %vm7660_vm8, %vm7660_vm8  ;;  %v6511_v20 = vld [vmem:[%s7325_s16 + $0x70] sm:$0xff]   ;;  %vm1053_vm8 = vcmask 1024  }
 0x180   : > { %5572 = vmatprep.subr.bf16.mxu0 %v6957_v4  ;;  %vm7829_vm2 = vmpackc.low %vm7677_vm11, %vm7677_vm11  ;;  %vm4562_vm11 = vcmask (!%p5221_p5), 1046534  }
 0x181   : > { %5591 = vmatpush3.bf16.msra.mxu1 %v6461_v21  ;;  %1040 = vadd.xlane.f32.xlu1 %v1039_v22  ;;  %v6512_v21 = vld [vmem:[%s7325_s16 + $0x38] sm:$0xff]  }
 0x182   : > { %5592 = vmatprep.subr.bf16.mxu1 %v6957_v4  ;;  %v6513_v22 = vld [vmem:[%s7325_s16 + $0x78] sm:$0xff]  }
 0x183   : > { %5573 = vmatpush3.bf16.msra.mxu0 %v6462_v23  ;;  %v6514_v23 = vld [vmem:[%s7325_s16 + $0x80] sm:$0xff]  }
 0x184   : > { %5574 = vmatprep.subr.bf16.mxu0 %v6957_v4 }
 0x185   : > { %5593 = vmatpush3.bf16.msra.mxu1 %v6463_v27  ;;  %1043 = vadd.xlane.f32.xlu1 %v1042_v28  ;;  %v6516_v27 = vld [vmem:[%s7325_s16 + $0x88] sm:$0xff]  }
 0x186   : > { %5594 = vmatprep.subr.bf16.mxu1 %v6957_v4  ;;  %v6517_v28 = vld [vmem:[%s7325_s16 + $0xc8] sm:$0xff]  }
 0x187   : > { %5575 = vmatpush3.bf16.msra.mxu0 %v6464_v29  ;;  %v6518_v29 = vld [vmem:[%s7325_s16 + $0x90] sm:$0xff]  }
 0x188   : > { %5600 = vmatprep.subr.bf16.mxu0 %v6957_v4 }
 0x189   : > { %5595 = vmatpush3.bf16.msra.mxu1 %v6465_v30  ;;  %v6519_v30 = vld [vmem:[%s7325_s16 + $0xd0] sm:$0xff]  }
 0x18a   : > { %5577 = vmatmul.mubr.msk.bf16.vlgmr.msra.gmra.mrb[4].mxu0 %vm7705_vm4, %v6961_v44  ;;  %5620 = vmatprep.subr.bf16.mxu1 %v6957_v4 }
 0x18b   : > { %5601 = vmatpush3.bf16.msra.mxu0 %v6466_v31  ;;  %5616 = vmatprep.mubr.msk.bf16.mxu0 %vm8514_vm15, %v6957_v4  ;;  %v6520_v31 = vld [vmem:[%s7325_s16 + $0x98] sm:$0xff]  }
 0x18c   : > { %5597 = vmatmul.mubr.msk.bf16.vlgmr.msra.gmra.mrb[4].mxu1 %vm7718_vm0, %v6961_v44  ;;  %5602 = vmatprep.subr.bf16.mxu0 %v6957_v4 }
 0x18d   : > { %5621 = vmatpush3.bf16.msra.mxu1 %v6467_v33  ;;  %5636 = vmatprep.mubr.msk.bf16.mxu1 %vm8514_vm15, %v6957_v4  ;;  %v6521_v33 = vld [vmem:[%s7325_s16 + $0xd8] sm:$0xff]  }
 0x18e   : > { %5622 = vmatprep.subr.bf16.mxu1 %v6957_v4 }
 0x18f   : > { %5603 = vmatpush3.bf16.msra.mxu0 %v6468_v34  ;;  %v1012_v34 = vld [vmem:[#allocation3] sm:$0x3] }
 0x190   : > { %5604 = vmatprep.subr.bf16.mxu0 %v6957_v4 }
 0x191   : > { %5623 = vmatpush3.bf16.msra.mxu1 %v6469_v37  ;;  %v6522_v37 = vld [vmem:[%s7325_s16 + $0xa0] sm:$0xff]  }
 0x192   : > { %5624 = vmatprep.subr.bf16.mxu1 %v6957_v4 }
 0x193   : > { %5605 = vmatpush3.bf16.msra.mxu0 %v6470_v38 }
 0x194   : > { %5606 = vmatprep.subr.bf16.mxu0 %v6957_v4 }
 0x195   : > { %5625 = vmatpush3.bf16.msra.mxu1 %v6471_v26  ;;  %v1013_v26 = vld [vmem:[#allocation3 + $0x2] sm:$0x3] }
 0x196   : > { %5626 = vmatprep.subr.bf16.mxu1 %v6957_v4 }
 0x197   : > { %5607 = vmatpush3.bf16.msra.mxu0 %v6472_v39 }
 0x198   : > { %5608 = vmatprep.subr.bf16.mxu0 %v6957_v4 }
 0x199   : > { %5627 = vmatpush3.bf16.msra.mxu1 %v6473_v41  ;;  %v6523_v41 = vld [vmem:[%s7325_s16 + $0xe0] sm:$0xff]  }
 0x19a   : > { %5628 = vmatprep.subr.bf16.mxu1 %v6957_v4 }
 0x19b   : > { %5609 = vmatpush3.bf16.msra.mxu0 %v6474_v42 }
 0x19c   : > { %5610 = vmatprep.subr.bf16.mxu0 %v6957_v4 }
 0x19d   : > { %5629 = vmatpush3.bf16.msra.mxu1 %v6475_v43 }
 0x19e   : > { %5630 = vmatprep.subr.bf16.mxu1 %v6957_v4 }
 0x19f   : > { %5611 = vmatpush3.bf16.msra.mxu0 %v6476_v45  ;;  %v6524_v45 = vld [vmem:[%s7325_s16 + $0xa8] sm:$0xff]  }
 0x1a0   : > { %5612 = vmatprep.subr.bf16.mxu0 %v6957_v4 }
 0x1a1   : > { %5631 = vmatpush3.bf16.msra.mxu1 %v6477_v46  ;;  %v1014_v46 = vld [vmem:[#allocation3 + $0x4] sm:$0x3] }
 0x1a2   : > { %5632 = vmatprep.subr.bf16.mxu1 %v6957_v4 }
 0x1a3   : > { %5613 = vmatpush3.bf16.msra.mxu0 %v6478_v47  ;;  %v6525_v47 = vld [vmem:[%s7325_s16 + $0xe8] sm:$0xff]  }
 0x1a4   : > { %5614 = vmatprep.subr.bf16.mxu0 %v6957_v4 }
 0x1a5   : > { %5633 = vmatpush3.bf16.msra.mxu1 %v6479_v48 }
 0x1a6   : > { %5634 = vmatprep.subr.bf16.mxu1 %v6957_v4 }
 0x1a7   : > { %5615 = vmatpush3.bf16.msra.mxu0 %v6480_v49 }
 0x1a8   : > { %5640 = vmatprep.subr.bf16.mxu0 %v6957_v4 }
 0x1a9   : > { %5635 = vmatpush3.bf16.msra.mxu1 %v6481_v51  ;;  %v6526_v51 = vld [vmem:[%s7325_s16 + $0xb0] sm:$0xff]  }
 0x1aa   : > { %5617 = vmatmul.mubr.msk.bf16.vlgmr.msra.gmra.mrb[8].mxu0 %vm7760_vm14, %v6961_v44  ;;  %5660 = vmatprep.subr.bf16.mxu1 %v6957_v4 }
 0x1ab   : > { %5641 = vmatpush3.bf16.msra.mxu0 %v6482_v52  ;;  %5656 = vmatprep.mubr.msk.bf16.mxu0 %vm8514_vm15, %v6957_v4  ;;  %v1016_v52 = vld [vmem:[#allocation3 + $0x8] sm:$0x3] }
 0x1ac   : > { %5637 = vmatmul.mubr.msk.bf16.vlgmr.msra.gmra.mrb[8].mxu1 %vm7770_vm3, %v6961_v44  ;;  %5642 = vmatprep.subr.bf16.mxu0 %v6957_v4 }
 0x1ad   : > { %5661 = vmatpush3.bf16.msra.mxu1 %v6483_v54  ;;  %5676 = vmatprep.mubr.msk.bf16.mxu1 %vm8514_vm15, %v6957_v4  ;;  %v6527_v54 = vld [vmem:[%s7325_s16 + $0xf0] sm:$0xff]  }
 0x1ae   : > { %5662 = vmatprep.subr.bf16.mxu1 %v6957_v4 }
 0x1af   : > { %5643 = vmatpush3.bf16.msra.mxu0 %v6484_v55 }
 0x1b0   : > { %5644 = vmatprep.subr.bf16.mxu0 %v6957_v4 }
 0x1b1   : > { %5663 = vmatpush3.bf16.msra.mxu1 %v6485_v57 }
 0x1b2   : > { %5664 = vmatprep.subr.bf16.mxu1 %v6957_v4 }
 0x1b3   : > { %5645 = vmatpush3.bf16.msra.mxu0 %v6486_v58  ;;  %v6528_v58 = vld [vmem:[%s7325_s16 + $0xb8] sm:$0xff]  }
 0x1b4   : > { %5646 = vmatprep.subr.bf16.mxu0 %v6957_v4 }
 0x1b5   : > { %5665 = vmatpush3.bf16.msra.mxu1 %v6487_v59  ;;  %v1015_v59 = vld [vmem:[#allocation3 + $0x6] sm:$0x3] }
 0x1b6   : > { %5666 = vmatprep.subr.bf16.mxu1 %v6957_v4 }
 0x1b7   : > { %5647 = vmatpush3.bf16.msra.mxu0 %v6488_v60  ;;  %v6529_v60 = vld [vmem:[%s7325_s16 + $0xf8] sm:$0xff]  }
 0x1b8   : > { %5648 = vmatprep.subr.bf16.mxu0 %v6957_v4 }
 0x1b9   : > { %5667 = vmatpush3.bf16.msra.mxu1 %v6489_v61 }
 0x1ba   : > { %5668 = vmatprep.subr.bf16.mxu1 %v6957_v4 }
 0x1bb   : > { %5649 = vmatpush3.bf16.msra.mxu0 %v6490_v62 }
 0x1bc   : > { %5650 = vmatprep.subr.bf16.mxu0 %v6957_v4 }
 0x1bd   : > { %5669 = vmatpush3.bf16.msra.mxu1 %v6491_v63  ;;  %v6530_v63 = vld [vmem:[%s7325_s16 + $0x100] sm:$0xff]  }
 0x1be   : > { %5670 = vmatprep.subr.bf16.mxu1 %v6957_v4 }
 0x1bf   : > { %5651 = vmatpush3.bf16.msra.mxu0 %v6492_v0  ;;  %v1017_v0 = vld [vmem:[#allocation3 + $0xa] sm:$0x3] }
 0x1c0   : > { %5652 = vmatprep.subr.bf16.mxu0 %v6957_v4 }
 0x1c1   : > { %5671 = vmatpush3.bf16.msra.mxu1 %v6493_v1  ;;  %v6531_v1 = vld [vmem:[%s7325_s16 + $0x140] sm:$0xff]  }
 0x1c2   : > { %5672 = vmatprep.subr.bf16.mxu1 %v6957_v4 }
 0x1c3   : > { %5653 = vmatpush3.bf16.msra.mxu0 %v6494_v2 }
 0x1c4   : > { %5654 = vmatprep.subr.bf16.mxu0 %v6957_v4 }
 0x1c5   : > { %5673 = vmatpush3.bf16.msra.mxu1 %v6495_v3 }
 0x1c6   : > { %5674 = vmatprep.subr.bf16.mxu1 %v6957_v4 }
 0x1c7   : > { %5655 = vmatpush3.bf16.msra.mxu0 %v6496_v5  ;;  %v6532_v5 = vld [vmem:[%s7325_s16 + $0x108] sm:$0xff]  }
 0x1c8   : > { %5680 = vmatprep.subr.bf16.mxu0 %v6957_v4 }
 0x1c9   : > { %5675 = vmatpush3.bf16.msra.mxu1 %v6497_v6  ;;  %v1018_v6 = vld [vmem:[#allocation3 + $0xc] sm:$0x3] }
 0x1ca   : > { %5657 = vmatmul.mubr.msk.bf16.vlgmr.msra.gmra.mrb[12].mxu0 %vm7817_vm1, %v6961_v44  ;;  %5700 = vmatprep.subr.bf16.mxu1 %v6957_v4 }
 0x1cb   : > { %5681 = vmatpush3.bf16.msra.mxu0 %v6498_v24  ;;  %5696 = vmatprep.mubr.msk.bf16.mxu0 %vm8514_vm15, %v6957_v4  ;;  %v6533_v24 = vld [vmem:[%s7325_s16 + $0x148] sm:$0xff]  }
 0x1cc   : > { %5677 = vmatmul.mubr.msk.bf16.vlgmr.msra.gmra.mrb[12].mxu1 %vm7829_vm2, %v6961_v44  ;;  %5682 = vmatprep.subr.bf16.mxu0 %v6957_v4 }
 0x1cd   : > { %5701 = vmatpush3.bf16.msra.mxu1 %v6499_v8  ;;  %5716 = vmatprep.mubr.msk.bf16.mxu1 %vm8514_vm15, %v6957_v4 }
 0x1ce   : > { %5702 = vmatprep.subr.bf16.mxu1 %v6957_v4 }
 0x1cf   : > { %5683 = vmatpush3.bf16.msra.mxu0 %v6500_v36 }
 0x1d0   : > { %5684 = vmatprep.subr.bf16.mxu0 %v6957_v4 }
 0x1d1   : > { %5703 = vmatpush3.bf16.msra.mxu1 %v6501_v10  ;;  %v6534_v10 = vld [vmem:[%s7325_s16 + $0x110] sm:$0xff]  }
 0x1d2   : > { %5704 = vmatprep.subr.bf16.mxu1 %v6957_v4 }
 0x1d3   : > { %5685 = vmatpush3.bf16.msra.mxu0 %v6502_v11  ;;  %v1019_v11 = vld [vmem:[#allocation3 + $0xe] sm:$0x3] }
 0x1d4   : > { %5686 = vmatprep.subr.bf16.mxu0 %v6957_v4 }
 0x1d5   : > { %5705 = vmatpush3.bf16.msra.mxu1 %v6503_v12  ;;  %v6535_v12 = vld [vmem:[%s7325_s16 + $0x150] sm:$0xff]  }
 0x1d6   : > { %5706 = vmatprep.subr.bf16.mxu1 %v6957_v4 }
 0x1d7   : > { %5687 = vmatpush3.bf16.msra.mxu0 %v6504_v13 }
 0x1d8   : > { %5688 = vmatprep.subr.bf16.mxu0 %v6957_v4 }
 0x1d9   : > { %5707 = vmatpush3.bf16.msra.mxu1 %v6505_v14 }
 0x1da   : > { %5708 = vmatprep.subr.bf16.mxu1 %v6957_v4 }
 0x1db   : > { %5689 = vmatpush3.bf16.msra.mxu0 %v6506_v15  ;;  %v6536_v15 = vld [vmem:[%s7325_s16 + $0x118] sm:$0xff]  }
 0x1dc   : > { %5690 = vmatprep.subr.bf16.mxu0 %v6957_v4 }
 0x1dd   : > { %5709 = vmatpush3.bf16.msra.mxu1 %v6507_v16  ;;  %v6537_v16 = vld [vmem:[%s7325_s16 + $0x158] sm:$0xff]  }
 0x1de   : > { %5710 = vmatprep.subr.bf16.mxu1 %v6957_v4 }
 0x1df   : > { %5691 = vmatpush3.bf16.msra.mxu0 %v6508_v17  ;;  %v6538_v17 = vld [vmem:[%s7325_s16 + $0x120] sm:$0xff]  }
 0x1e0   : > { %5692 = vmatprep.subr.bf16.mxu0 %v6957_v4 }
 0x1e1   : > { %5711 = vmatpush3.bf16.msra.mxu1 %v6509_v18  ;;  %v6539_v18 = vld [vmem:[%s7325_s16 + $0x160] sm:$0xff]  }
 0x1e2   : > { %5712 = vmatprep.subr.bf16.mxu1 %v6957_v4 }
 0x1e3   : > { %5693 = vmatpush3.bf16.msra.mxu0 %v6510_v19  ;;  %v6540_v19 = vld [vmem:[%s7325_s16 + $0x128] sm:$0xff]  }
 0x1e4   : > { %5694 = vmatprep.subr.bf16.mxu0 %v6957_v4 }
 0x1e5   : > { %5713 = vmatpush3.bf16.msra.mxu1 %v6511_v20  ;;  %v6541_v20 = vld [vmem:[%s7325_s16 + $0x168] sm:$0xff]  }
 0x1e6   : > { %5714 = vmatprep.subr.bf16.mxu1 %v6957_v4 }
 0x1e7   : > { %5695 = vmatpush3.bf16.msra.mxu0 %v6512_v21  ;;  %v6542_v21 = vld [vmem:[%s7325_s16 + $0x130] sm:$0xff]  }
 0x1e8   : > { %5720 = vmatprep.subr.bf16.mxu0 %v6957_v4 }
 0x1e9   : > { %5715 = vmatpush3.bf16.msra.mxu1 %v6513_v22  ;;  %v6543_v22 = vld [vmem:[%s7325_s16 + $0x170] sm:$0xff]  }
 0x1ea   : > { %5697 = vmatmul.mubr.msk.bf16.vlgmr.msra.gmra.mrb[0].mxu0 %vm7541_vm9, %v6961_v44  ;;  %5740 = vmatprep.subr.bf16.mxu1 %v6957_v4 }
 0x1eb   : > { %5721 = vmatpush3.bf16.msra.mxu0 %v6514_v23  ;;  %5736 = vmatprep.mubr.msk.bf16.mxu0 %vm8514_vm15, %v6957_v4  ;;  %v6544_v23 = vld [vmem:[%s7325_s16 + $0x138] sm:$0xff]  }
 0x1ec   : > { %5717 = vmatmul.mubr.msk.bf16.vlgmr.msra.gmra.mrb[0].mxu1 %vm7564_vm13, %v6961_v44  ;;  %5722 = vmatprep.subr.bf16.mxu0 %v6957_v4 }
 0x1ed   : > { %5741 = vmatpush3.bf16.msra.mxu1 %v6515_v25  ;;  %5756 = vmatprep.mubr.msk.bf16.mxu1 %vm8514_vm15, %v6957_v4  ;;  %v6545_v25 = vld [vmem:[%s7325_s16 + $0x178] sm:$0xff]  }
 0x1ee   : > { %5742 = vmatprep.subr.bf16.mxu1 %v6957_v4 }
 0x1ef   : > { %5723 = vmatpush3.bf16.msra.mxu0 %v6516_v27  ;;  %v6546_v27 = vld [vmem:[%s7325_s16 + $0x180] sm:$0xff]  }
 0x1f0   : > { %5724 = vmatprep.subr.bf16.mxu0 %v6957_v4 }
 0x1f1   : > { %5743 = vmatpush3.bf16.msra.mxu1 %v6517_v28  ;;  %v6547_v28 = vld [vmem:[%s7325_s16 + $0x1c0] sm:$0xff]  }
 0x1f2   : > { %5744 = vmatprep.subr.bf16.mxu1 %v6957_v4 }
 0x1f3   : > { %5725 = vmatpush3.bf16.msra.mxu0 %v6518_v29  ;;  %v6548_v29 = vld [vmem:[%s7325_s16 + $0x188] sm:$0xff]  }
 0x1f4   : > { %5726 = vmatprep.subr.bf16.mxu0 %v6957_v4 }
 0x1f5   : > { %5745 = vmatpush3.bf16.msra.mxu1 %v6519_v30  ;;  %v6549_v30 = vld [vmem:[%s7325_s16 + $0x1c8] sm:$0xff]  }
 0x1f6   : > { %5746 = vmatprep.subr.bf16.mxu1 %v6957_v4 }
 0x1f7   : > { %5727 = vmatpush3.bf16.msra.mxu0 %v6520_v31  ;;  %v6550_v31 = vld [vmem:[%s7325_s16 + $0x190] sm:$0xff]  }
 0x1f8   : > { %v1023_v38 = vpop.xlane.xlu0 %1022  ;;  %5728 = vmatprep.subr.bf16.mxu0 %v6957_v4 }
 0x1f9   : > { %v1045_v39 = vadd.f32 %v1023_v38, %v1012_v34  ;;  %5747 = vmatpush3.bf16.msra.mxu1 %v6521_v33  ;;  %v6551_v33 = vld [vmem:[%s7325_s16 + $0x1d0] sm:$0xff]   ;;  %v6552_v34 = vld [vmem:[%s7325_s16 + $0x198] sm:$0xff]   ;;  %v6554_v38 = vld [vmem:[%s7325_s16 + $0x1a0] sm:$0xff]  }
 0x1fa   : > { %v1026_v42 = vpop.xlane.xlu1 %1025  ;;  %5748 = vmatprep.subr.bf16.mxu1 %v6957_v4 }
 0x1fb   : > { %1054 = vst.msk [vmem:[#allocation3] sm:$0x3] %vm1053_vm8, %v1045_v39  ;;  %v1046_v43 = vadd.f32 %v1026_v42, %v1013_v26  ;;  %5729 = vmatpush3.bf16.msra.mxu0 %v6522_v37  ;;  %v6553_v37 = vld [vmem:[%s7325_s16 + $0x1d8] sm:$0xff]   ;;  %v6555_v26 = vld [vmem:[%s7325_s16 + $0x1e0] sm:$0xff]   ;;  %v6556_v39 = vld [vmem:[%s7325_s16 + $0x1a8] sm:$0xff]  }
 0x1fc   : > { %5730 = vmatprep.subr.bf16.mxu0 %v6957_v4  ;;  %v6558_v42 = vld [vmem:[%s7325_s16 + $0x1b0] sm:$0xff]  }
 0x1fd   : > { %1055 = vst.msk [vmem:[#allocation3 + $0x2] sm:$0x3] %vm1053_vm8, %v1046_v43  ;;  %5749 = vmatpush3.bf16.msra.mxu1 %v6523_v41  ;;  %v6557_v41 = vld [vmem:[%s7325_s16 + $0x1e8] sm:$0xff]   ;;  %v6559_v43 = vld [vmem:[%s7325_s16 + $0x1f0] sm:$0xff]  }
 0x1fe   : > { %v1029_v48 = vpop.xlane.xlu1 %1028  ;;  %5750 = vmatprep.subr.bf16.mxu1 %v6957_v4 }
 0x1ff   : > { %v1047_v49 = vadd.f32 %v1029_v48, %v1014_v46  ;;  %5731 = vmatpush3.bf16.msra.mxu0 %v6524_v45  ;;  %v6560_v45 = vld [vmem:[%s7325_s16 + $0x1b8] sm:$0xff]   ;;  %v6563_v48 = vld [vmem:[%s7327_s18 + $0x40] sm:$0xff]  }
 0x200   : > { %5732 = vmatprep.subr.bf16.mxu0 %v6957_v4  ;;  %v6561_v46 = vld [vmem:[%s7325_s16 + $0x1f8] sm:$0xff]  }
 0x201   : > { %1056 = vst.msk [vmem:[#allocation3 + $0x4] sm:$0x3] %vm1053_vm8, %v1047_v49  ;;  %5751 = vmatpush3.bf16.msra.mxu1 %v6525_v47  ;;  %v6562_v47 = vld [vmem:[%s7327_s18] sm:$0xff]   ;;  %v6564_v49 = vld [vmem:[%s7327_s18 + $0x8] sm:$0xff]  }
 0x202   : > { %v1035_v55 = vpop.xlane.xlu1 %1034  ;;  %5752 = vmatprep.subr.bf16.mxu1 %v6957_v4 }
 0x203   : > { %v1049_v57 = vadd.f32 %v1035_v55, %v1016_v52  ;;  %5733 = vmatpush3.bf16.msra.mxu0 %v6526_v51  ;;  %v6565_v51 = vld [vmem:[%s7327_s18 + $0x48] sm:$0xff]   ;;  %v6566_v52 = vld [vmem:[%s7327_s18 + $0x10] sm:$0xff]   ;;  %v6568_v55 = vld [vmem:[%s7327_s18 + $0x18] sm:$0xff]  }
 0x204   : > { %5734 = vmatprep.subr.bf16.mxu0 %v6957_v4 }
 0x205   : > { %1058 = vst.msk [vmem:[#allocation3 + $0x8] sm:$0x3] %vm1053_vm8, %v1049_v57  ;;  %5753 = vmatpush3.bf16.msra.mxu1 %v6527_v54  ;;  %v6567_v54 = vld [vmem:[%s7327_s18 + $0x50] sm:$0xff]   ;;  %v6569_v57 = vld [vmem:[%s7327_s18 + $0x58] sm:$0xff]  }
 0x206   : > { %v1032_v61 = vpop.xlane.xlu1 %1031  ;;  %5754 = vmatprep.subr.bf16.mxu1 %v6957_v4 }
 0x207   : > { %v1048_v62 = vadd.f32 %v1032_v61, %v1015_v59  ;;  %5735 = vmatpush3.bf16.msra.mxu0 %v6528_v58  ;;  %v6570_v58 = vld [vmem:[%s7327_s18 + $0x20] sm:$0xff]   ;;  %v6573_v61 = vld [vmem:[%s7327_s18 + $0x68] sm:$0xff]  }
 0x208   : > { %5760 = vmatprep.subr.bf16.mxu0 %v6957_v4  ;;  %v6571_v59 = vld [vmem:[%s7327_s18 + $0x60] sm:$0xff]  }
 0x209   : > { %1057 = vst.msk [vmem:[#allocation3 + $0x6] sm:$0x3] %vm1053_vm8, %v1048_v62  ;;  %5755 = vmatpush3.bf16.msra.mxu1 %v6529_v60  ;;  %v6572_v60 = vld [vmem:[%s7327_s18 + $0x28] sm:$0xff]   ;;  %v6574_v62 = vld [vmem:[%s7327_s18 + $0x30] sm:$0xff]  }
 0x20a   : > { %5737 = vmatmul.mubr.msk.bf16.vlgmr.msra.gmra.mrb[4].mxu0 %vm7705_vm4, %v6961_v44  ;;  %v1038_v2 = vpop.xlane.xlu1 %1037  ;;  %5780 = vmatprep.subr.bf16.mxu1 %v6957_v4 }
 0x20b   : > { %5761 = vmatpush3.bf16.msra.mxu0 %v6530_v63  ;;  %v1050_v3 = vadd.f32 %v1038_v2, %v1017_v0  ;;  %5776 = vmatprep.mubr.msk.bf16.mxu0 %vm8514_vm15, %v6957_v4  ;;  %v6575_v63 = vld [vmem:[%s7327_s18 + $0x70] sm:$0xff]   ;;  %v6576_v0 = vld [vmem:[%s7327_s18 + $0x38] sm:$0xff]   ;;  %v6578_v2 = vld [vmem:[%s7327_s18 + $0x80] sm:$0xff]  }
 0x20c   : > { %5757 = vmatmul.mubr.msk.bf16.vlgmr.msra.gmra.mrb[4].mxu1 %vm7718_vm0, %v6961_v44  ;;  %5762 = vmatprep.subr.bf16.mxu0 %v6957_v4 }
 0x20d   : > { %1059 = vst.msk [vmem:[#allocation3 + $0xa] sm:$0x3] %vm1053_vm8, %v1050_v3  ;;  %5781 = vmatpush3.bf16.msra.mxu1 %v6531_v1  ;;  %5796 = vmatprep.mubr.msk.bf16.mxu1 %vm8514_vm15, %v6957_v4  ;;  %v6577_v1 = vld [vmem:[%s7327_s18 + $0x78] sm:$0xff]   ;;  %v6579_v3 = vld [vmem:[%s7327_s18 + $0xc0] sm:$0xff]  }
 0x20e   : > { %v1041_v8 = vpop.xlane.xlu1 %1040  ;;  %5782 = vmatprep.subr.bf16.mxu1 %v6957_v4 }
 0x20f   : > { %5763 = vmatpush3.bf16.msra.mxu0 %v6532_v5  ;;  %v1051_v36 = vadd.f32 %v1041_v8, %v1018_v6  ;;  %v6580_v5 = vld [vmem:[%s7327_s18 + $0x88] sm:$0xff]   ;;  %v6583_v8 = vld [vmem:[%s7327_s18 + $0xd0] sm:$0xff]  }
 0x210   : > { %5764 = vmatprep.subr.bf16.mxu0 %v6957_v4  ;;  %v6581_v6 = vld [vmem:[%s7327_s18 + $0xc8] sm:$0xff]  }
 0x211   : > { %1060 = vst.msk [vmem:[#allocation3 + $0xc] sm:$0x3] %vm1053_vm8, %v1051_v36  ;;  %5783 = vmatpush3.bf16.msra.mxu1 %v6533_v24  ;;  %v6582_v24 = vld [vmem:[%s7327_s18 + $0x90] sm:$0xff]   ;;  %v6584_v36 = vld [vmem:[%s7327_s18 + $0x98] sm:$0xff]  }
 0x212   : > { %v1044_v13 = vpop.xlane.xlu1 %1043  ;;  %5784 = vmatprep.subr.bf16.mxu1 %v6957_v4 }
 0x213   : > { %5765 = vmatpush3.bf16.msra.mxu0 %v6534_v10  ;;  %v1052_v14 = vadd.f32 %v1044_v13, %v1019_v11  ;;  %v6585_v10 = vld [vmem:[%s7327_s18 + $0xd8] sm:$0xff]   ;;  %v6586_v11 = vld [vmem:[%s7327_s18 + $0xa0] sm:$0xff]   ;;  %v6588_v13 = vld [vmem:[%s7327_s18 + $0xa8] sm:$0xff]  }
 0x214   : > { %5766 = vmatprep.subr.bf16.mxu0 %v6957_v4 }
 0x215   : > { %1061 = vst.msk [vmem:[#allocation3 + $0xe] sm:$0x3] %vm1053_vm8, %v1052_v14  ;;  %5785 = vmatpush3.bf16.msra.mxu1 %v6535_v12  ;;  %v6587_v12 = vld [vmem:[%s7327_s18 + $0xe0] sm:$0xff]   ;;  %v6589_v14 = vld [vmem:[%s7327_s18 + $0xe8] sm:$0xff]  }
 0x216   : > { %5786 = vmatprep.subr.bf16.mxu1 %v6957_v4 }
 0x217   : > { %5767 = vmatpush3.bf16.msra.mxu0 %v6536_v15  ;;  %v6590_v15 = vld [vmem:[%s7327_s18 + $0xb0] sm:$0xff]  }
 0x218   : > { %5768 = vmatprep.subr.bf16.mxu0 %v6957_v4 }
 0x219   : > { %5787 = vmatpush3.bf16.msra.mxu1 %v6537_v16  ;;  %v6591_v16 = vld [vmem:[%s7327_s18 + $0xf0] sm:$0xff]  }
 0x21a   : > { %5788 = vmatprep.subr.bf16.mxu1 %v6957_v4 }
 0x21b   : > { %5769 = vmatpush3.bf16.msra.mxu0 %v6538_v17  ;;  %v6592_v17 = vld [vmem:[%s7327_s18 + $0xb8] sm:$0xff]  }
 0x21c   : > { %5770 = vmatprep.subr.bf16.mxu0 %v6957_v4 }
 0x21d   : > { %5789 = vmatpush3.bf16.msra.mxu1 %v6539_v18  ;;  %v6593_v18 = vld [vmem:[%s7327_s18 + $0xf8] sm:$0xff]  }
 0x21e   : > { %5790 = vmatprep.subr.bf16.mxu1 %v6957_v4 }
 0x21f   : > { %5771 = vmatpush3.bf16.msra.mxu0 %v6540_v19  ;;  %v6594_v19 = vld [vmem:[%s7327_s18 + $0x100] sm:$0xff]  }
 0x220   : > { %5772 = vmatprep.subr.bf16.mxu0 %v6957_v4 }
 0x221   : > { %5791 = vmatpush3.bf16.msra.mxu1 %v6541_v20  ;;  %v6595_v20 = vld [vmem:[%s7327_s18 + $0x140] sm:$0xff]  }
 0x222   : > { %5792 = vmatprep.subr.bf16.mxu1 %v6957_v4 }
 0x223   : > { %5773 = vmatpush3.bf16.msra.mxu0 %v6542_v21  ;;  %v6596_v21 = vld [vmem:[%s7327_s18 + $0x108] sm:$0xff]  }
 0x224   : > { %5774 = vmatprep.subr.bf16.mxu0 %v6957_v4 }
 0x225   : > { %5793 = vmatpush3.bf16.msra.mxu1 %v6543_v22  ;;  %v6597_v22 = vld [vmem:[%s7327_s18 + $0x148] sm:$0xff]  }
 0x226   : > { %5794 = vmatprep.subr.bf16.mxu1 %v6957_v4 }
 0x227   : > { %5775 = vmatpush3.bf16.msra.mxu0 %v6544_v23  ;;  %v6598_v23 = vld [vmem:[%s7327_s18 + $0x110] sm:$0xff]  }
 0x228   : > { %5800 = vmatprep.subr.bf16.mxu0 %v6957_v4 }
 0x229   : > { %5795 = vmatpush3.bf16.msra.mxu1 %v6545_v25  ;;  %v6599_v25 = vld [vmem:[%s7327_s18 + $0x150] sm:$0xff]  }
 0x22a   : > { %5777 = vmatmul.mubr.msk.bf16.vlgmr.msra.gmra.mrb[8].mxu0 %vm7760_vm14, %v6961_v44  ;;  %5820 = vmatprep.subr.bf16.mxu1 %v6957_v4 }
 0x22b   : > { %5801 = vmatpush3.bf16.msra.mxu0 %v6546_v27  ;;  %5816 = vmatprep.mubr.msk.bf16.mxu0 %vm8514_vm15, %v6957_v4  ;;  %v6600_v27 = vld [vmem:[%s7327_s18 + $0x118] sm:$0xff]  }
 0x22c   : > { %5797 = vmatmul.mubr.msk.bf16.vlgmr.msra.gmra.mrb[8].mxu1 %vm7770_vm3, %v6961_v44  ;;  %5802 = vmatprep.subr.bf16.mxu0 %v6957_v4 }
 0x22d   : > { %5821 = vmatpush3.bf16.msra.mxu1 %v6547_v28  ;;  %5836 = vmatprep.mubr.msk.bf16.mxu1 %vm8514_vm15, %v6957_v4  ;;  %v6601_v28 = vld [vmem:[%s7327_s18 + $0x158] sm:$0xff]  }
 0x22e   : > { %5822 = vmatprep.subr.bf16.mxu1 %v6957_v4 }
 0x22f   : > { %5803 = vmatpush3.bf16.msra.mxu0 %v6548_v29  ;;  %v6602_v29 = vld [vmem:[%s7327_s18 + $0x120] sm:$0xff]  }
 0x230   : > { %5804 = vmatprep.subr.bf16.mxu0 %v6957_v4 }
 0x231   : > { %5823 = vmatpush3.bf16.msra.mxu1 %v6549_v30  ;;  %v6603_v30 = vld [vmem:[%s7327_s18 + $0x160] sm:$0xff]  }
 0x232   : > { %5824 = vmatprep.subr.bf16.mxu1 %v6957_v4 }
 0x233   : > { %5805 = vmatpush3.bf16.msra.mxu0 %v6550_v31  ;;  %v6604_v31 = vld [vmem:[%s7327_s18 + $0x128] sm:$0xff]  }
 0x234   : > { %5806 = vmatprep.subr.bf16.mxu0 %v6957_v4 }
 0x235   : > { %5825 = vmatpush3.bf16.msra.mxu1 %v6551_v33  ;;  %v6605_v33 = vld [vmem:[%s7327_s18 + $0x168] sm:$0xff]  }
 0x236   : > { %5826 = vmatprep.subr.bf16.mxu1 %v6957_v4 }
 0x237   : > { %5807 = vmatpush3.bf16.msra.mxu0 %v6552_v34  ;;  %v6606_v34 = vld [vmem:[%s7327_s18 + $0x130] sm:$0xff]  }
 0x238   : > { %5808 = vmatprep.subr.bf16.mxu0 %v6957_v4 }
 0x239   : > { %5827 = vmatpush3.bf16.msra.mxu1 %v6553_v37  ;;  %v6607_v37 = vld [vmem:[%s7327_s18 + $0x170] sm:$0xff]  }
 0x23a   : > { %5828 = vmatprep.subr.bf16.mxu1 %v6957_v4 }
 0x23b   : > { %5809 = vmatpush3.bf16.msra.mxu0 %v6554_v38  ;;  %v6608_v38 = vld [vmem:[%s7327_s18 + $0x138] sm:$0xff]  }
 0x23c   : > { %5810 = vmatprep.subr.bf16.mxu0 %v6957_v4 }
 0x23d   : > { %5829 = vmatpush3.bf16.msra.mxu1 %v6555_v26  ;;  %v6609_v26 = vld [vmem:[%s7327_s18 + $0x178] sm:$0xff]  }
 0x23e   : > { %5830 = vmatprep.subr.bf16.mxu1 %v6957_v4 }
 0x23f   : > { %5811 = vmatpush3.bf16.msra.mxu0 %v6556_v39  ;;  %v6610_v39 = vld [vmem:[%s7327_s18 + $0x180] sm:$0xff]  }
 0x240   : > { %5812 = vmatprep.subr.bf16.mxu0 %v6957_v4 }
 0x241   : > { %5831 = vmatpush3.bf16.msra.mxu1 %v6557_v41  ;;  %v6611_v41 = vld [vmem:[%s7327_s18 + $0x1c0] sm:$0xff]  }
 0x242   : > { %5832 = vmatprep.subr.bf16.mxu1 %v6957_v4 }
 0x243   : > { %5813 = vmatpush3.bf16.msra.mxu0 %v6558_v42  ;;  %v6612_v42 = vld [vmem:[%s7327_s18 + $0x188] sm:$0xff]  }
 0x244   : > { %5814 = vmatprep.subr.bf16.mxu0 %v6957_v4 }
 0x245   : > { %5833 = vmatpush3.bf16.msra.mxu1 %v6559_v43  ;;  %v6613_v43 = vld [vmem:[%s7327_s18 + $0x1c8] sm:$0xff]  }
 0x246   : > { %5834 = vmatprep.subr.bf16.mxu1 %v6957_v4 }
 0x247   : > { %5815 = vmatpush3.bf16.msra.mxu0 %v6560_v45  ;;  %v6614_v45 = vld [vmem:[%s7327_s18 + $0x190] sm:$0xff]  }
 0x248   : > { %5840 = vmatprep.subr.bf16.mxu0 %v6957_v4 }
 0x249   : > { %5835 = vmatpush3.bf16.msra.mxu1 %v6561_v46  ;;  %v6615_v46 = vld [vmem:[%s7327_s18 + $0x1d0] sm:$0xff]  }
 0x24a   : > { %5817 = vmatmul.mubr.msk.bf16.vlgmr.msra.gmra.mrb[12].mxu0 %vm7817_vm1, %v6961_v44  ;;  %5860 = vmatprep.subr.bf16.mxu1 %v6957_v4 }
 0x24b   : > { %5841 = vmatpush3.bf16.msra.mxu0 %v6562_v47  ;;  %5856 = vmatprep.mubr.msk.bf16.mxu0 %vm8514_vm15, %v6957_v4  ;;  %v6616_v47 = vld [vmem:[%s7327_s18 + $0x198] sm:$0xff]  }
 0x24c   : > { %5837 = vmatmul.mubr.msk.bf16.vlgmr.msra.gmra.mrb[12].mxu1 %vm7829_vm2, %v6961_v44  ;;  %5842 = vmatprep.subr.bf16.mxu0 %v6957_v4 }
 0x24d   : > { %5861 = vmatpush3.bf16.msra.mxu1 %v6563_v48  ;;  %5876 = vmatprep.mubr.msk.bf16.mxu1 %vm8514_vm15, %v6957_v4  ;;  %v6617_v48 = vld [vmem:[%s7327_s18 + $0x1d8] sm:$0xff]  }
 0x24e   : > { %5862 = vmatprep.subr.bf16.mxu1 %v6957_v4 }
 0x24f   : > { %5843 = vmatpush3.bf16.msra.mxu0 %v6564_v49  ;;  %v6618_v49 = vld [vmem:[%s7327_s18 + $0x1a0] sm:$0xff]  }
 0x250   : > { %5844 = vmatprep.subr.bf16.mxu0 %v6957_v4 }
 0x251   : > { %5863 = vmatpush3.bf16.msra.mxu1 %v6565_v51  ;;  %v6619_v51 = vld [vmem:[%s7327_s18 + $0x1e0] sm:$0xff]  }
 0x252   : > { %5864 = vmatprep.subr.bf16.mxu1 %v6957_v4 }
 0x253   : > { %5845 = vmatpush3.bf16.msra.mxu0 %v6566_v52  ;;  %v6620_v52 = vld [vmem:[%s7327_s18 + $0x1a8] sm:$0xff]  }
 0x254   : > { %5846 = vmatprep.subr.bf16.mxu0 %v6957_v4 }
 0x255   : > { %5865 = vmatpush3.bf16.msra.mxu1 %v6567_v54  ;;  %v6621_v54 = vld [vmem:[%s7327_s18 + $0x1e8] sm:$0xff]  }
 0x256   : > { %5866 = vmatprep.subr.bf16.mxu1 %v6957_v4 }
 0x257   : > { %5847 = vmatpush3.bf16.msra.mxu0 %v6568_v55  ;;  %v6622_v55 = vld [vmem:[%s7327_s18 + $0x1b0] sm:$0xff]  }
 0x258   : > { %5848 = vmatprep.subr.bf16.mxu0 %v6957_v4 }
 0x259   : > { %5867 = vmatpush3.bf16.msra.mxu1 %v6569_v57  ;;  %v6623_v57 = vld [vmem:[%s7327_s18 + $0x1f0] sm:$0xff]  }
 0x25a   : > { %5868 = vmatprep.subr.bf16.mxu1 %v6957_v4 }
 0x25b   : > { %5849 = vmatpush3.bf16.msra.mxu0 %v6570_v58  ;;  %v6624_v58 = vld [vmem:[%s7327_s18 + $0x1b8] sm:$0xff]  }
 0x25c   : > { %5850 = vmatprep.subr.bf16.mxu0 %v6957_v4 }
 0x25d   : > { %5869 = vmatpush3.bf16.msra.mxu1 %v6571_v59  ;;  %v6625_v59 = vld [vmem:[%s7327_s18 + $0x1f8] sm:$0xff]  }
 0x25e   : > { %5870 = vmatprep.subr.bf16.mxu1 %v6957_v4 }
 0x25f   : > { %5851 = vmatpush3.bf16.msra.mxu0 %v6572_v60  ;;  %v6626_v60 = vld [vmem:[%s7341_s20] sm:$0xff]  }
 0x260   : > { %5852 = vmatprep.subr.bf16.mxu0 %v6957_v4 }
 0x261   : > { %5871 = vmatpush3.bf16.msra.mxu1 %v6573_v61  ;;  %v6627_v61 = vld [vmem:[%s7341_s20 + $0x40] sm:$0xff]  }
 0x262   : > { %5872 = vmatprep.subr.bf16.mxu1 %v6957_v4 }
 0x263   : > { %5853 = vmatpush3.bf16.msra.mxu0 %v6574_v62  ;;  %v6628_v62 = vld [vmem:[%s7341_s20 + $0x8] sm:$0xff]  }
 0x264   : > { %5854 = vmatprep.subr.bf16.mxu0 %v6957_v4 }
 0x265   : > { %5873 = vmatpush3.bf16.msra.mxu1 %v6575_v63  ;;  %v6629_v63 = vld [vmem:[%s7341_s20 + $0x48] sm:$0xff]  }
 0x266   : > { %5874 = vmatprep.subr.bf16.mxu1 %v6957_v4 }
 0x267   : > { %5855 = vmatpush3.bf16.msra.mxu0 %v6576_v0  ;;  %v6630_v0 = vld [vmem:[%s7341_s20 + $0x10] sm:$0xff]  }
 0x268   : > { %5880 = vmatprep.subr.bf16.mxu0 %v6957_v4 }
 0x269   : > { %5875 = vmatpush3.bf16.msra.mxu1 %v6577_v1  ;;  %v6631_v1 = vld [vmem:[%s7341_s20 + $0x50] sm:$0xff]  }
 0x26a   : > { %5857 = vmatmul.mubr.msk.bf16.vlgmr.msra.gmra.mrb[0].mxu0 %vm7541_vm9, %v6961_v44  ;;  %5900 = vmatprep.subr.bf16.mxu1 %v6957_v4 }
 0x26b   : > { %5881 = vmatpush3.bf16.msra.mxu0 %v6578_v2  ;;  %5896 = vmatprep.mubr.msk.bf16.mxu0 %vm8514_vm15, %v6957_v4  ;;  %v6632_v2 = vld [vmem:[%s7341_s20 + $0x18] sm:$0xff]  }
 0x26c   : > { %5877 = vmatmul.mubr.msk.bf16.vlgmr.msra.gmra.mrb[0].mxu1 %vm7564_vm13, %v6961_v44  ;;  %5882 = vmatprep.subr.bf16.mxu0 %v6957_v4 }
 0x26d   : > { %5901 = vmatpush3.bf16.msra.mxu1 %v6579_v3  ;;  %5916 = vmatprep.mubr.msk.bf16.mxu1 %vm8514_vm15, %v6957_v4  ;;  %v6633_v3 = vld [vmem:[%s7341_s20 + $0x58] sm:$0xff]  }
 0x26e   : > { %5902 = vmatprep.subr.bf16.mxu1 %v6957_v4 }
 0x26f   : > { %5883 = vmatpush3.bf16.msra.mxu0 %v6580_v5  ;;  %v6634_v5 = vld [vmem:[%s7341_s20 + $0x20] sm:$0xff]  }
 0x270   : > { %5884 = vmatprep.subr.bf16.mxu0 %v6957_v4 }
 0x271   : > { %5903 = vmatpush3.bf16.msra.mxu1 %v6581_v6  ;;  %v6635_v6 = vld [vmem:[%s7341_s20 + $0x60] sm:$0xff]  }
 0x272   : > { %5904 = vmatprep.subr.bf16.mxu1 %v6957_v4 }
 0x273   : > { %5885 = vmatpush3.bf16.msra.mxu0 %v6582_v24  ;;  %v6636_v24 = vld [vmem:[%s7341_s20 + $0x28] sm:$0xff]  }
 0x274   : > { %5886 = vmatprep.subr.bf16.mxu0 %v6957_v4 }
 0x275   : > { %5905 = vmatpush3.bf16.msra.mxu1 %v6583_v8  ;;  %v6637_v8 = vld [vmem:[%s7341_s20 + $0x68] sm:$0xff]  }
 0x276   : > { %5906 = vmatprep.subr.bf16.mxu1 %v6957_v4 }
 0x277   : > { %5887 = vmatpush3.bf16.msra.mxu0 %v6584_v36  ;;  %v6638_v36 = vld [vmem:[%s7341_s20 + $0x30] sm:$0xff]  }
 0x278   : > { %5888 = vmatprep.subr.bf16.mxu0 %v6957_v4 }
 0x279   : > { %5907 = vmatpush3.bf16.msra.mxu1 %v6585_v10  ;;  %v6639_v10 = vld [vmem:[%s7341_s20 + $0x70] sm:$0xff]  }
 0x27a   : > { %5908 = vmatprep.subr.bf16.mxu1 %v6957_v4 }
 0x27b   : > { %5889 = vmatpush3.bf16.msra.mxu0 %v6586_v11  ;;  %v6640_v11 = vld [vmem:[%s7341_s20 + $0x38] sm:$0xff]  }
 0x27c   : > { %5890 = vmatprep.subr.bf16.mxu0 %v6957_v4 }
 0x27d   : > { %5909 = vmatpush3.bf16.msra.mxu1 %v6587_v12  ;;  %v6641_v12 = vld [vmem:[%s7341_s20 + $0x78] sm:$0xff]  }
 0x27e   : > { %5910 = vmatprep.subr.bf16.mxu1 %v6957_v4 }
 0x27f   : > { %5891 = vmatpush3.bf16.msra.mxu0 %v6588_v13  ;;  %v6642_v13 = vld [vmem:[%s7341_s20 + $0x80] sm:$0xff]  }
 0x280   : > { %5892 = vmatprep.subr.bf16.mxu0 %v6957_v4 }
 0x281   : > { %5911 = vmatpush3.bf16.msra.mxu1 %v6589_v14  ;;  %v6643_v14 = vld [vmem:[%s7341_s20 + $0xc0] sm:$0xff]  }
 0x282   : > { %5912 = vmatprep.subr.bf16.mxu1 %v6957_v4 }
 0x283   : > { %5893 = vmatpush3.bf16.msra.mxu0 %v6590_v15  ;;  %v6644_v15 = vld [vmem:[%s7341_s20 + $0x88] sm:$0xff]  }
 0x284   : > { %5894 = vmatprep.subr.bf16.mxu0 %v6957_v4 }
 0x285   : > { %5913 = vmatpush3.bf16.msra.mxu1 %v6591_v16  ;;  %v6645_v16 = vld [vmem:[%s7341_s20 + $0xc8] sm:$0xff]  }
 0x286   : > { %5914 = vmatprep.subr.bf16.mxu1 %v6957_v4 }
 0x287   : > { %5895 = vmatpush3.bf16.msra.mxu0 %v6592_v17  ;;  %v6648_v17 = vld [vmem:[%s7341_s20 + $0x98] sm:$0xff]  }
 0x288   : > { %5920 = vmatprep.subr.bf16.mxu0 %v6957_v4 }
 0x289   : > { %5915 = vmatpush3.bf16.msra.mxu1 %v6593_v18  ;;  %v6649_v18 = vld [vmem:[%s7341_s20 + $0xd8] sm:$0xff]  }
 0x28a   : > { %5897 = vmatmul.mubr.msk.bf16.vlgmr.msra.gmra.mrb[4].mxu0 %vm7705_vm4, %v6961_v44  ;;  %5940 = vmatprep.subr.bf16.mxu1 %v6957_v4 }
 0x28b   : > { %5921 = vmatpush3.bf16.msra.mxu0 %v6594_v19  ;;  %5936 = vmatprep.mubr.msk.bf16.mxu0 %vm8514_vm15, %v6957_v4  ;;  %v6650_v19 = vld [vmem:[%s7341_s20 + $0xa0] sm:$0xff]  }
 0x28c   : > { %5917 = vmatmul.mubr.msk.bf16.vlgmr.msra.gmra.mrb[4].mxu1 %vm7718_vm0, %v6961_v44  ;;  %5922 = vmatprep.subr.bf16.mxu0 %v6957_v4 }
 0x28d   : > { %5941 = vmatpush3.bf16.msra.mxu1 %v6595_v20  ;;  %5956 = vmatprep.mubr.msk.bf16.mxu1 %vm8514_vm15, %v6957_v4  ;;  %v6651_v20 = vld [vmem:[%s7341_s20 + $0xe0] sm:$0xff]  }
 0x28e   : > { %5942 = vmatprep.subr.bf16.mxu1 %v6957_v4 }
 0x28f   : > { %5923 = vmatpush3.bf16.msra.mxu0 %v6596_v21  ;;  %v6652_v21 = vld [vmem:[%s7341_s20 + $0xa8] sm:$0xff]  }
 0x290   : > { %5924 = vmatprep.subr.bf16.mxu0 %v6957_v4 }
 0x291   : > { %5943 = vmatpush3.bf16.msra.mxu1 %v6597_v22  ;;  %v6653_v22 = vld [vmem:[%s7341_s20 + $0xe8] sm:$0xff]  }
 0x292   : > { %5944 = vmatprep.subr.bf16.mxu1 %v6957_v4 }
 0x293   : > { %5925 = vmatpush3.bf16.msra.mxu0 %v6598_v23  ;;  %v6654_v23 = vld [vmem:[%s7341_s20 + $0xb0] sm:$0xff]  }
 0x294   : > { %5926 = vmatprep.subr.bf16.mxu0 %v6957_v4 }
 0x295   : > { %5945 = vmatpush3.bf16.msra.mxu1 %v6599_v25  ;;  %v6655_v25 = vld [vmem:[%s7341_s20 + $0xf0] sm:$0xff]  }
 0x296   : > { %5946 = vmatprep.subr.bf16.mxu1 %v6957_v4 }
 0x297   : > { %5927 = vmatpush3.bf16.msra.mxu0 %v6600_v27  ;;  %v6656_v27 = vld [vmem:[%s7341_s20 + $0xb8] sm:$0xff]  }
 0x298   : > { %5928 = vmatprep.subr.bf16.mxu0 %v6957_v4 }
 0x299   : > { %5947 = vmatpush3.bf16.msra.mxu1 %v6601_v28  ;;  %v6657_v28 = vld [vmem:[%s7341_s20 + $0xf8] sm:$0xff]  }
 0x29a   : > { %5948 = vmatprep.subr.bf16.mxu1 %v6957_v4 }
 0x29b   : > { %5929 = vmatpush3.bf16.msra.mxu0 %v6602_v29  ;;  %v6658_v29 = vld [vmem:[%s7341_s20 + $0x100] sm:$0xff]  }
 0x29c   : > { %5930 = vmatprep.subr.bf16.mxu0 %v6957_v4 }
 0x29d   : > { %5949 = vmatpush3.bf16.msra.mxu1 %v6603_v30  ;;  %v6659_v30 = vld [vmem:[%s7341_s20 + $0x140] sm:$0xff]  }
 0x29e   : > { %5950 = vmatprep.subr.bf16.mxu1 %v6957_v4 }
 0x29f   : > { %5931 = vmatpush3.bf16.msra.mxu0 %v6604_v31  ;;  %v6660_v31 = vld [vmem:[%s7341_s20 + $0x108] sm:$0xff]  }
 0x2a0   : > { %5932 = vmatprep.subr.bf16.mxu0 %v6957_v4 }
 0x2a1   : > { %5951 = vmatpush3.bf16.msra.mxu1 %v6605_v33  ;;  %v6661_v33 = vld [vmem:[%s7341_s20 + $0x148] sm:$0xff]  }
 0x2a2   : > { %5952 = vmatprep.subr.bf16.mxu1 %v6957_v4 }
 0x2a3   : > { %5933 = vmatpush3.bf16.msra.mxu0 %v6606_v34  ;;  %v6664_v34 = vld [vmem:[%s7341_s20 + $0x118] sm:$0xff]  }
 0x2a4   : > { %5934 = vmatprep.subr.bf16.mxu0 %v6957_v4 }
 0x2a5   : > { %5953 = vmatpush3.bf16.msra.mxu1 %v6607_v37  ;;  %v6665_v37 = vld [vmem:[%s7341_s20 + $0x158] sm:$0xff]  }
 0x2a6   : > { %5954 = vmatprep.subr.bf16.mxu1 %v6957_v4 }
 0x2a7   : > { %5935 = vmatpush3.bf16.msra.mxu0 %v6608_v38  ;;  %v6666_v38 = vld [vmem:[%s7341_s20 + $0x120] sm:$0xff]  }
 0x2a8   : > { %5960 = vmatprep.subr.bf16.mxu0 %v6957_v4 }
 0x2a9   : > { %5955 = vmatpush3.bf16.msra.mxu1 %v6609_v26  ;;  %v6667_v26 = vld [vmem:[%s7341_s20 + $0x160] sm:$0xff]  }
 0x2aa   : > { %5937 = vmatmul.mubr.msk.bf16.vlgmr.msra.gmra.mrb[8].mxu0 %vm7760_vm14, %v6961_v44  ;;  %5980 = vmatprep.subr.bf16.mxu1 %v6957_v4 }
 0x2ab   : > { %5961 = vmatpush3.bf16.msra.mxu0 %v6610_v39  ;;  %5976 = vmatprep.mubr.msk.bf16.mxu0 %vm8514_vm15, %v6957_v4  ;;  %v6668_v39 = vld [vmem:[%s7341_s20 + $0x128] sm:$0xff]  }
 0x2ac   : > { %5957 = vmatmul.mubr.msk.bf16.vlgmr.msra.gmra.mrb[8].mxu1 %vm7770_vm3, %v6961_v44  ;;  %5962 = vmatprep.subr.bf16.mxu0 %v6957_v4 }
 0x2ad   : > { %5981 = vmatpush3.bf16.msra.mxu1 %v6611_v41  ;;  %5996 = vmatprep.mubr.msk.bf16.mxu1 %vm8514_vm15, %v6957_v4  ;;  %v6669_v41 = vld [vmem:[%s7341_s20 + $0x168] sm:$0xff]  }
 0x2ae   : > { %5982 = vmatprep.subr.bf16.mxu1 %v6957_v4 }
 0x2af   : > { %5963 = vmatpush3.bf16.msra.mxu0 %v6612_v42  ;;  %v6670_v42 = vld [vmem:[%s7341_s20 + $0x130] sm:$0xff]  }
 0x2b0   : > { %5964 = vmatprep.subr.bf16.mxu0 %v6957_v4 }
 0x2b1   : > { %5983 = vmatpush3.bf16.msra.mxu1 %v6613_v43  ;;  %v6671_v43 = vld [vmem:[%s7341_s20 + $0x170] sm:$0xff]  }
 0x2b2   : > { %5984 = vmatprep.subr.bf16.mxu1 %v6957_v4 }
 0x2b3   : > { %5965 = vmatpush3.bf16.msra.mxu0 %v6614_v45  ;;  %v6672_v45 = vld [vmem:[%s7341_s20 + $0x138] sm:$0xff]  }
 0x2b4   : > { %5966 = vmatprep.subr.bf16.mxu0 %v6957_v4 }
 0x2b5   : > { %5985 = vmatpush3.bf16.msra.mxu1 %v6615_v46  ;;  %v6673_v46 = vld [vmem:[%s7341_s20 + $0x178] sm:$0xff]  }
 0x2b6   : > { %5986 = vmatprep.subr.bf16.mxu1 %v6957_v4 }
 0x2b7   : > { %5967 = vmatpush3.bf16.msra.mxu0 %v6616_v47  ;;  %v6674_v47 = vld [vmem:[%s7341_s20 + $0x180] sm:$0xff]  }
 0x2b8   : > { %5968 = vmatprep.subr.bf16.mxu0 %v6957_v4 }
 0x2b9   : > { %5987 = vmatpush3.bf16.msra.mxu1 %v6617_v48  ;;  %v6675_v48 = vld [vmem:[%s7341_s20 + $0x1c0] sm:$0xff]  }
 0x2ba   : > { %5988 = vmatprep.subr.bf16.mxu1 %v6957_v4 }
 0x2bb   : > { %5969 = vmatpush3.bf16.msra.mxu0 %v6618_v49  ;;  %v6676_v49 = vld [vmem:[%s7341_s20 + $0x188] sm:$0xff]  }
 0x2bc   : > { %5970 = vmatprep.subr.bf16.mxu0 %v6957_v4 }
 0x2bd   : > { %5989 = vmatpush3.bf16.msra.mxu1 %v6619_v51  ;;  %v6677_v51 = vld [vmem:[%s7341_s20 + $0x1c8] sm:$0xff]  }
 0x2be   : > { %5990 = vmatprep.subr.bf16.mxu1 %v6957_v4 }
 0x2bf   : > { %5971 = vmatpush3.bf16.msra.mxu0 %v6620_v52  ;;  %v6680_v52 = vld [vmem:[%s7341_s20 + $0x198] sm:$0xff]  }
 0x2c0   : > { %5972 = vmatprep.subr.bf16.mxu0 %v6957_v4 }
 0x2c1   : > { %5991 = vmatpush3.bf16.msra.mxu1 %v6621_v54  ;;  %v6681_v54 = vld [vmem:[%s7341_s20 + $0x1d8] sm:$0xff]  }
 0x2c2   : > { %5992 = vmatprep.subr.bf16.mxu1 %v6957_v4 }
 0x2c3   : > { %5973 = vmatpush3.bf16.msra.mxu0 %v6622_v55  ;;  %v6682_v55 = vld [vmem:[%s7341_s20 + $0x1a0] sm:$0xff]  }
 0x2c4   : > { %5974 = vmatprep.subr.bf16.mxu0 %v6957_v4 }
 0x2c5   : > { %5993 = vmatpush3.bf16.msra.mxu1 %v6623_v57  ;;  %v6683_v57 = vld [vmem:[%s7341_s20 + $0x1e0] sm:$0xff]  }
 0x2c6   : > { %5994 = vmatprep.subr.bf16.mxu1 %v6957_v4 }
 0x2c7   : > { %5975 = vmatpush3.bf16.msra.mxu0 %v6624_v58  ;;  %v6684_v58 = vld [vmem:[%s7341_s20 + $0x1a8] sm:$0xff]  }
 0x2c8   : > { %6000 = vmatprep.subr.bf16.mxu0 %v6957_v4 }
 0x2c9   : > { %5995 = vmatpush3.bf16.msra.mxu1 %v6625_v59  ;;  %v6685_v59 = vld [vmem:[%s7341_s20 + $0x1e8] sm:$0xff]  }
 0x2ca   : > { %5977 = vmatmul.mubr.msk.bf16.vlgmr.msra.gmra.mrb[12].mxu0 %vm7817_vm1, %v6961_v44  ;;  %6020 = vmatprep.subr.bf16.mxu1 %v6957_v4 }
 0x2cb   : > { %6001 = vmatpush3.bf16.msra.mxu0 %v6626_v60  ;;  %6016 = vmatprep.mubr.msk.bf16.mxu0 %vm8514_vm15, %v6957_v4  ;;  %v6686_v60 = vld [vmem:[%s7341_s20 + $0x1b0] sm:$0xff]  }
 0x2cc   : > { %5997 = vmatmul.mubr.msk.bf16.vlgmr.msra.gmra.mrb[12].mxu1 %vm7829_vm2, %v6961_v44  ;;  %6002 = vmatprep.subr.bf16.mxu0 %v6957_v4 }
 0x2cd   : > { %6021 = vmatpush3.bf16.msra.mxu1 %v6627_v61  ;;  %6036 = vmatprep.mubr.msk.bf16.mxu1 %vm8514_vm15, %v6957_v4  ;;  %v6687_v61 = vld [vmem:[%s7341_s20 + $0x1f0] sm:$0xff]  }
 0x2ce   : > { %6022 = vmatprep.subr.bf16.mxu1 %v6957_v4 }
 0x2cf   : > { %6003 = vmatpush3.bf16.msra.mxu0 %v6628_v62  ;;  %v6688_v62 = vld [vmem:[%s7341_s20 + $0x1b8] sm:$0xff]  }
 0x2d0   : > { %6004 = vmatprep.subr.bf16.mxu0 %v6957_v4 }
 0x2d1   : > { %6023 = vmatpush3.bf16.msra.mxu1 %v6629_v63  ;;  %v6689_v63 = vld [vmem:[%s7341_s20 + $0x1f8] sm:$0xff]  }
 0x2d2   : > { %6024 = vmatprep.subr.bf16.mxu1 %v6957_v4 }
 0x2d3   : > { %6005 = vmatpush3.bf16.msra.mxu0 %v6630_v0  ;;  %v1070_v0 = vld [vmem:[#allocation2] sm:$0x3] }
 0x2d4   : > { %6006 = vmatprep.subr.bf16.mxu0 %v6957_v4 }
 0x2d5   : > { %6025 = vmatpush3.bf16.msra.mxu1 %v6631_v1 }
 0x2d6   : > { %6026 = vmatprep.subr.bf16.mxu1 %v6957_v4 }
 0x2d7   : > { %6007 = vmatpush3.bf16.msra.mxu0 %v6632_v2  ;;  %v1071_v2 = vld [vmem:[#allocation2 + $0x2] sm:$0x3] }
 0x2d8   : > { %6008 = vmatprep.subr.bf16.mxu0 %v6957_v4 }
 0x2d9   : > { %6027 = vmatpush3.bf16.msra.mxu1 %v6633_v3 }
 0x2da   : > { %6028 = vmatprep.subr.bf16.mxu1 %v6957_v4 }
 0x2db   : > { %6009 = vmatpush3.bf16.msra.mxu0 %v6634_v5 }
 0x2dc   : > { %6010 = vmatprep.subr.bf16.mxu0 %v6957_v4 }
 0x2dd   : > { %6029 = vmatpush3.bf16.msra.mxu1 %v6635_v6 }
 0x2de   : > { %6030 = vmatprep.subr.bf16.mxu1 %v6957_v4 }
 0x2df   : > { %6011 = vmatpush3.bf16.msra.mxu0 %v6636_v24 }
 0x2e0   : > { %6012 = vmatprep.subr.bf16.mxu0 %v6957_v4 }
 0x2e1   : > { %6031 = vmatpush3.bf16.msra.mxu1 %v6637_v8 }
 0x2e2   : > { %6032 = vmatprep.subr.bf16.mxu1 %v6957_v4 }
 0x2e3   : > { %6013 = vmatpush3.bf16.msra.mxu0 %v6638_v36 }
 0x2e4   : > { %6014 = vmatprep.subr.bf16.mxu0 %v6957_v4 }
 0x2e5   : > { %6033 = vmatpush3.bf16.msra.mxu1 %v6639_v10 }
 0x2e6   : > { %6034 = vmatprep.subr.bf16.mxu1 %v6957_v4 }
 0x2e7   : > { %6015 = vmatpush3.bf16.msra.mxu0 %v6640_v11 }
 0x2e8   : > { %6040 = vmatprep.subr.bf16.mxu0 %v6957_v4 }
 0x2e9   : > { %6035 = vmatpush3.bf16.msra.mxu1 %v6641_v12 }
 0x2ea   : > { %6017 = vmatmul.mubr.msk.bf16.vlgmr.msra.gmra.mrb[0].mxu0 %vm7541_vm9, %v6961_v44  ;;  %6060 = vmatprep.subr.bf16.mxu1 %v6957_v4  ;;  %vm4547_vm9 = vcmask (!%p5221_p5), 1041409  }
 0x2eb   : > { %6041 = vmatpush3.bf16.msra.mxu0 %v6642_v13  ;;  %6056 = vmatprep.mubr.msk.bf16.mxu0 %vm8514_vm15, %v6957_v4  ;;  %v1073_v13 = vld [vmem:[#allocation2 + $0x6] sm:$0x3] }
 0x2ec   : > { %6037 = vmatmul.mubr.msk.bf16.vlgmr.msra.gmra.mrb[0].mxu1 %vm7564_vm13, %v6961_v44  ;;  %6042 = vmatprep.subr.bf16.mxu0 %v6957_v4  ;;  %vm4550_vm13 = vcmask (!%p5221_p5), 1042434  }
 0x2ed   : > { %6061 = vmatpush3.bf16.msra.mxu1 %v6643_v14  ;;  %6076 = vmatprep.mubr.msk.bf16.mxu1 %vm8514_vm15, %v6957_v4 }
 0x2ee   : > { %6062 = vmatprep.subr.bf16.mxu1 %v6957_v4 }
 0x2ef   : > { %6043 = vmatpush3.bf16.msra.mxu0 %v6644_v15 }
 0x2f0   : > { %6044 = vmatprep.subr.bf16.mxu0 %v6957_v4 }
 0x2f1   : > { %6063 = vmatpush3.bf16.msra.mxu1 %v6645_v16 }
 0x2f2   : > { %6064 = vmatprep.subr.bf16.mxu1 %v6957_v4 }
 0x2f3   : > { %6045 = vmatpush3.bf16.msra.mxu0 %v6646_v40 }
 0x2f4   : > { %6046 = vmatprep.subr.bf16.mxu0 %v6957_v4 }
 0x2f5   : > { %6065 = vmatpush3.bf16.msra.mxu1 %v6647_v50 }
 0x2f6   : > { %6066 = vmatprep.subr.bf16.mxu1 %v6957_v4 }
 0x2f7   : > { %6047 = vmatpush3.bf16.msra.mxu0 %v6648_v17 }
 0x2f8   : > { %6048 = vmatprep.subr.bf16.mxu0 %v6957_v4 }
 0x2f9   : > { %6067 = vmatpush3.bf16.msra.mxu1 %v6649_v18 }
 0x2fa   : > { %6068 = vmatprep.subr.bf16.mxu1 %v6957_v4 }
 0x2fb   : > { %6049 = vmatpush3.bf16.msra.mxu0 %v6650_v19  ;;  %v1074_v19 = vld [vmem:[#allocation2 + $0x8] sm:$0x3] }
 0x2fc   : > { %6050 = vmatprep.subr.bf16.mxu0 %v6957_v4 }
 0x2fd   : > { %6069 = vmatpush3.bf16.msra.mxu1 %v6651_v20 }
 0x2fe   : > { %6070 = vmatprep.subr.bf16.mxu1 %v6957_v4 }
 0x2ff   : > { %6051 = vmatpush3.bf16.msra.mxu0 %v6652_v21  ;;  %v1075_v21 = vld [vmem:[#allocation2 + $0xa] sm:$0x3] }
 0x300   : > { %6052 = vmatprep.subr.bf16.mxu0 %v6957_v4 }
 0x301   : > { %6071 = vmatpush3.bf16.msra.mxu1 %v6653_v22 }
 0x302   : > { %6072 = vmatprep.subr.bf16.mxu1 %v6957_v4 }
 0x303   : > { %6053 = vmatpush3.bf16.msra.mxu0 %v6654_v23 }
 0x304   : > { %6054 = vmatprep.subr.bf16.mxu0 %v6957_v4 }
 0x305   : > { %6073 = vmatpush3.bf16.msra.mxu1 %v6655_v25 }
 0x306   : > { %6074 = vmatprep.subr.bf16.mxu1 %v6957_v4 }
 0x307   : > { %6055 = vmatpush3.bf16.msra.mxu0 %v6656_v27 }
 0x308   : > { %6080 = vmatprep.subr.bf16.mxu0 %v6957_v4 }
 0x309   : > { %6075 = vmatpush3.bf16.msra.mxu1 %v6657_v28 }
 0x30a   : > { %6057 = vmatmul.mubr.msk.bf16.vlgmr.msra.gmra.mrb[4].mxu0 %vm7705_vm4, %v6961_v44  ;;  %6100 = vmatprep.subr.bf16.mxu1 %v6957_v4 }
 0x30b   : > { %6081 = vmatpush3.bf16.msra.mxu0 %v6658_v29  ;;  %6096 = vmatprep.mubr.msk.bf16.mxu0 %vm8514_vm15, %v6957_v4 }
 0x30c   : > { %6077 = vmatmul.mubr.msk.bf16.vlgmr.msra.gmra.mrb[4].mxu1 %vm7718_vm0, %v6961_v44  ;;  %6082 = vmatprep.subr.bf16.mxu0 %v6957_v4 }
 0x30d   : > { %6101 = vmatpush3.bf16.msra.mxu1 %v6659_v30  ;;  %6116 = vmatprep.mubr.msk.bf16.mxu1 %vm8514_vm15, %v6957_v4 }
 0x30e   : > { %6102 = vmatprep.subr.bf16.mxu1 %v6957_v4 }
 0x30f   : > { %6083 = vmatpush3.bf16.msra.mxu0 %v6660_v31 }
 0x310   : > { %6084 = vmatprep.subr.bf16.mxu0 %v6957_v4 }
 0x311   : > { %6103 = vmatpush3.bf16.msra.mxu1 %v6661_v33 }
 0x312   : > { %6104 = vmatprep.subr.bf16.mxu1 %v6957_v4 }
 0x313   : > { %6085 = vmatpush3.bf16.msra.mxu0 %v6662_v32  ;;  %v1076_v32 = vld [vmem:[#allocation2 + $0xc] sm:$0x3] }
 0x314   : > { %6086 = vmatprep.subr.bf16.mxu0 %v6957_v4 }
 0x315   : > { %6105 = vmatpush3.bf16.msra.mxu1 %v6663_v35 }
 0x316   : > { %6106 = vmatprep.subr.bf16.mxu1 %v6957_v4 }
 0x317   : > { %6087 = vmatpush3.bf16.msra.mxu0 %v6664_v34  ;;  %v1077_v34 = vld [vmem:[#allocation2 + $0xe] sm:$0x3] }
 0x318   : > { %6088 = vmatprep.subr.bf16.mxu0 %v6957_v4 }
 0x319   : > { %6107 = vmatpush3.bf16.msra.mxu1 %v6665_v37 }
 0x31a   : > { %6108 = vmatprep.subr.bf16.mxu1 %v6957_v4 }
 0x31b   : > { %6089 = vmatpush3.bf16.msra.mxu0 %v6666_v38 }
 0x31c   : > { %6090 = vmatprep.subr.bf16.mxu0 %v6957_v4 }
 0x31d   : > { %6109 = vmatpush3.bf16.msra.mxu1 %v6667_v26 }
 0x31e   : > { %6110 = vmatprep.subr.bf16.mxu1 %v6957_v4 }
 0x31f   : > { %6091 = vmatpush3.bf16.msra.mxu0 %v6668_v39 }
 0x320   : > { %6092 = vmatprep.subr.bf16.mxu0 %v6957_v4 }
 0x321   : > { %6111 = vmatpush3.bf16.msra.mxu1 %v6669_v41 }
 0x322   : > { %6112 = vmatprep.subr.bf16.mxu1 %v6957_v4 }
 0x323   : > { %6093 = vmatpush3.bf16.msra.mxu0 %v6670_v42 }
 0x324   : > { %6094 = vmatprep.subr.bf16.mxu0 %v6957_v4 }
 0x325   : > { %6113 = vmatpush3.bf16.msra.mxu1 %v6671_v43 }
 0x326   : > { %6114 = vmatprep.subr.bf16.mxu1 %v6957_v4 }
 0x327   : > { %6095 = vmatpush3.bf16.msra.mxu0 %v6672_v45 }
 0x328   : > { %6120 = vmatprep.subr.bf16.mxu0 %v6957_v4 }
 0x329   : > { %6115 = vmatpush3.bf16.msra.mxu1 %v6673_v46 }
 0x32a   : > { %6097 = vmatmul.mubr.msk.bf16.vlgmr.msra.gmra.mrb[8].mxu0 %vm7760_vm14, %v6961_v44  ;;  %6140 = vmatprep.subr.bf16.mxu1 %v6957_v4 }
 0x32b   : > { %6121 = vmatpush3.bf16.msra.mxu0 %v6674_v47  ;;  %6136 = vmatprep.mubr.msk.bf16.mxu0 %vm8514_vm15, %v6957_v4  ;;  %v4452_v47 = vld [vmem:[#allocation3 + $0x4] sm:$0x3] (!%p5221_p5) }
 0x32c   : > { %6117 = vmatmul.mubr.msk.bf16.vlgmr.msra.gmra.mrb[8].mxu1 %vm7770_vm3, %v6961_v44  ;;  %6122 = vmatprep.subr.bf16.mxu0 %v6957_v4 }
 0x32d   : > { %6141 = vmatpush3.bf16.msra.mxu1 %v6675_v48  ;;  %6156 = vmatprep.mubr.msk.bf16.mxu1 %vm8514_vm15, %v6957_v4  ;;  %v4450_v48 = vld [vmem:[#allocation3] sm:$0x3] (!%p5221_p5)  ;;  %vm4553_vm15 = vcmask (!%p5221_p5), 1043459  }
 0x32e   : > { %6142 = vmatprep.subr.bf16.mxu1 %v6957_v4 }
 0x32f   : > { %6123 = vmatpush3.bf16.msra.mxu0 %v6676_v49  ;;  %v6962_v49 = vmov (!%p5221_p5), 0  }
 0x330   : > { %6124 = vmatprep.subr.bf16.mxu0 %v6957_v4  ;;  %6691 = vset.pattern.permute.xlu1 (!%p5221_p5), %v6962_v49 }
 0x331   : > { %6143 = vmatpush3.bf16.msra.mxu1 %v6677_v51  ;;  %6690 = vset.pattern.permute.xlu0 (!%p5221_p5), %v6962_v49  ;;  %v4460_v51 = vmax.f32 (!%p5221_p5), %v4452_v47, 1.0 }
 0x332   : > { %6144 = vmatprep.subr.bf16.mxu1 %v6957_v4 }
 0x333   : > { %6125 = vmatpush3.bf16.msra.mxu0 %v6678_v53  ;;  %v4458_v53 = vmax.f32 (!%p5221_p5), %v4450_v48, 1.0  ;;  %6692 = vrcp.f32 (!%p5221_p5), %v4460_v51 }
 0x334   : > { %6126 = vmatprep.subr.bf16.mxu0 %v6957_v4 }
 0x335   : > { %6145 = vmatpush3.bf16.msra.mxu1 %v6679_v56  ;;  %v4453_v56 = vld [vmem:[#allocation3 + $0x6] sm:$0x3] (!%p5221_p5)  ;;  %6694 = vrcp.f32 (!%p5221_p5), %v4458_v53 }
 0x336   : > { %6146 = vmatprep.subr.bf16.mxu1 %v6957_v4 }
 0x337   : > { %6127 = vmatpush3.bf16.msra.mxu0 %v6680_v52  ;;  %v4451_v52 = vld [vmem:[#allocation3 + $0x2] sm:$0x3] (!%p5221_p5) }
 0x338   : > { %6128 = vmatprep.subr.bf16.mxu0 %v6957_v4 }
 0x339   : > { %6147 = vmatpush3.bf16.msra.mxu1 %v6681_v54  ;;  %v4461_v54 = vmax.f32 (!%p5221_p5), %v4453_v56, 1.0 }
 0x33a   : > { %6148 = vmatprep.subr.bf16.mxu1 %v6957_v4 }
 0x33b   : > { %6129 = vmatpush3.bf16.msra.mxu0 %v6682_v55  ;;  %v4459_v55 = vmax.f32 (!%p5221_p5), %v4451_v52, 1.0  ;;  %6696 = vrcp.f32 (!%p5221_p5), %v4461_v54 }
 0x33c   : > { %6130 = vmatprep.subr.bf16.mxu0 %v6957_v4 }
 0x33d   : > { %6149 = vmatpush3.bf16.msra.mxu1 %v6683_v57  ;;  %v4455_v57 = vld [vmem:[#allocation3 + $0xa] sm:$0x3] (!%p5221_p5)  ;;  %6698 = vrcp.f32 (!%p5221_p5), %v4459_v55 }
 0x33e   : > { %6150 = vmatprep.subr.bf16.mxu1 %v6957_v4 }
 0x33f   : > { %6131 = vmatpush3.bf16.msra.mxu0 %v6684_v58  ;;  %v4454_v58 = vld [vmem:[#allocation3 + $0x8] sm:$0x3] (!%p5221_p5) }
 0x340   : > { %6132 = vmatprep.subr.bf16.mxu0 %v6957_v4 }
 0x341   : > { %6151 = vmatpush3.bf16.msra.mxu1 %v6685_v59  ;;  %v4463_v59 = vmax.f32 (!%p5221_p5), %v4455_v57, 1.0 }
 0x342   : > { %6152 = vmatprep.subr.bf16.mxu1 %v6957_v4 }
 0x343   : > { %6133 = vmatpush3.bf16.msra.mxu0 %v6686_v60  ;;  %v4462_v60 = vmax.f32 (!%p5221_p5), %v4454_v58, 1.0  ;;  %6700 = vrcp.f32 (!%p5221_p5), %v4463_v59 }
 0x344   : > { %6134 = vmatprep.subr.bf16.mxu0 %v6957_v4 }
 0x345   : > { %6153 = vmatpush3.bf16.msra.mxu1 %v6687_v61  ;;  %v4457_v61 = vld [vmem:[#allocation3 + $0xe] sm:$0x3] (!%p5221_p5)  ;;  %6702 = vrcp.f32 (!%p5221_p5), %v4462_v60 }
 0x346   : > { %6154 = vmatprep.subr.bf16.mxu1 %v6957_v4 }
 0x347   : > { %6135 = vmatpush3.bf16.msra.mxu0 %v6688_v62  ;;  %v4456_v62 = vld [vmem:[#allocation3 + $0xc] sm:$0x3] (!%p5221_p5) }
 0x349   : > { %6155 = vmatpush3.bf16.msra.mxu1 %v6689_v63  ;;  %v4465_v63 = vmax.f32 (!%p5221_p5), %v4457_v61, 1.0 }
 0x34a   : > { %6137 = vmatmul.mubr.msk.bf16.vlgmr.msra.gmra.mrb[12].mxu0 %vm7817_vm1, %v6961_v44 }
 0x34b   : > { %6704 = vrcp.f32 (!%p5221_p5), %v4465_v63 }
 0x34c   : > { %6157 = vmatmul.mubr.msk.bf16.vlgmr.msra.gmra.mrb[12].mxu1 %vm7829_vm2, %v6961_v44 }
 0x3bd   : > { %v3808_v1 = vpop.f32.mrb[0].mxu0 }
 0x3be   : > { %v6160_v3 = vadd.f32 %v3808_v1, %v1070_v0  ;;  %v6018_v5 = vpop.f32.mrb[1].mxu0  ;;  %v4464_v0 = vmax.f32 (!%p5221_p5), %v4456_v62, 1.0  ;;  %v6693_v1 = vpop.eup (!%p5221_p5), %6692 }
 0x3bf   : > { %v3811_v6 = vpop.f32.mrb[2].mxu0  ;;  %v3896_v24 = vpop.f32.mrb[0].mxu1 }
 0x3c0   : > { %4438 = vst [vmem:[#allocation2] sm:$0x3] %v6160_v3  ;;  %v6161_v8 = vadd.f32 %v3896_v24, %v1071_v2  ;;  %v6019_v4 = vpop.f32.mrb[3].mxu0  ;;  %v6038_v36 = vpop.f32.mrb[1].mxu1  ;;  %6706 = vrcp.f32 (!%p5221_p5), %v4464_v0  ;;  %v4479_v3 = vmul.f32 (!%p5221_p5), 0.25, %v6693_v1 }
 0x3c1   : > { %v3899_v10 = vpop.f32.mrb[2].mxu1  ;;  %v6695_v2 = vpop.eup (!%p5221_p5), %6694 }
 0x3c2   : > { %4439 = vst [vmem:[#allocation2 + $0x2] sm:$0x3] %v6161_v8  ;;  %v6039_v11 = vpop.f32.mrb[3].mxu1  ;;  %v6697_v5 = vpop.eup (!%p5221_p5), %6696  ;;  %v4475_v6 = vmul.f32 (!%p5221_p5), 0.25, %v6695_v2  ;;  %4502 = vperm.xlu1 (!%p5221_p5), %6691, %v4479_v3  }
 0x3c3   : > { %v6699_v24 = vpop.eup (!%p5221_p5), %6698  ;;  %v4481_v8 = vmul.f32 (!%p5221_p5), 0.25, %v6697_v5 }
 0x3c4   : > { %v6701_v4 = vpop.eup (!%p5221_p5), %6700  ;;  %4492 = vperm.xlu0 (!%p5221_p5), %6690, %v4475_v6   ;;  %v4477_v36 = vmul.f32 (!%p5221_p5), 0.25, %v6699_v24 }
 0x3c5   : > { %v6703_v10 = vpop.eup (!%p5221_p5), %6702  ;;  %v4485_v11 = vmul.f32 (!%p5221_p5), 0.25, %v6701_v4 }
 0x3c6   : > { %4507 = vperm.xlu1 (!%p5221_p5), %6691, %v4481_v8  }
 0x3c8   : > { %4497 = vperm.xlu0 (!%p5221_p5), %6690, %v4477_v36  }
 0x3ca   : > { %4517 = vperm.xlu1 (!%p5221_p5), %6691, %v4485_v11  }
 0x3dd   : > { %v3984_v12 = vpop.f32.mrb[4].mxu0 }
 0x3de   : > { %v6162_v14 = vadd.f32 %v3984_v12, %v1072_v7  ;;  %v6058_v9 = vpop.f32.mrb[5].mxu0  ;;  %v6705_v7 = vpop.eup (!%p5221_p5), %6704  ;;  %v4483_v12 = vmul.f32 (!%p5221_p5), 0.25, %v6703_v10 }
 0x3df   : > { %v3987_v44 = vpop.f32.mrb[6].mxu0  ;;  %v4072_v15 = vpop.f32.mrb[4].mxu1 }
 0x3e0   : > { %4440 = vst [vmem:[#allocation2 + $0x4] sm:$0x3] %v6162_v14  ;;  %v6163_v16 = vadd.f32 %v4072_v15, %v1073_v13  ;;  %v6059_v40 = vpop.f32.mrb[7].mxu0  ;;  %v6078_v50 = vpop.f32.mrb[5].mxu1  ;;  %v4489_v14 = vmul.f32 (!%p5221_p5), 0.25, %v6705_v7  ;;  %4512 = vperm.xlu0 (!%p5221_p5), %6690, %v4483_v12  }
 0x3e1   : > { %v4075_v17 = vpop.f32.mrb[6].mxu1  ;;  %v6707_v13 = vpop.eup (!%p5221_p5), %6706  ;;  %v4466_v44 = vld [vmem:[#allocation2] sm:$0x3] (!%p5221_p5) }
 0x3e2   : > { %4441 = vst [vmem:[#allocation2 + $0x6] sm:$0x3] %v6163_v16  ;;  %v6079_v18 = vpop.f32.mrb[7].mxu1  ;;  %v4487_v9 = vmul.f32 (!%p5221_p5), 0.25, %v6707_v13  ;;  %4527 = vperm.xlu1 (!%p5221_p5), %6691, %v4489_v14  }
 0x3e3   : > { %v4467_v18 = vld [vmem:[#allocation2 + $0x2] sm:$0x3] (!%p5221_p5) }
 0x3e4   : > { %4522 = vperm.xlu0 (!%p5221_p5), %6690, %v4487_v9  }
 0x3e7   : > { %v4468_v16 = vld [vmem:[#allocation2 + $0x4] sm:$0x3] (!%p5221_p5) }
 0x3e9   : > { %v4469_v17 = vld [vmem:[#allocation2 + $0x6] sm:$0x3] (!%p5221_p5) }
 0x3fd   : > { %v4160_v20 = vpop.f32.mrb[8].mxu0 }
 0x3fe   : > { %v6164_v22 = vadd.f32 %v4160_v20, %v1074_v19  ;;  %v6098_v23 = vpop.f32.mrb[9].mxu0 }
 0x3ff   : > { %v4163_v25 = vpop.f32.mrb[10].mxu0  ;;  %v4248_v27 = vpop.f32.mrb[8].mxu1 }
 0x400   : > { %4442 = vst [vmem:[#allocation2 + $0x8] sm:$0x3] %v6164_v22  ;;  %v6165_v28 = vadd.f32 %v4248_v27, %v1075_v21  ;;  %v6099_v29 = vpop.f32.mrb[11].mxu0  ;;  %v6118_v30 = vpop.f32.mrb[9].mxu1 }
 0x401   : > { %v4251_v31 = vpop.f32.mrb[10].mxu1 }
 0x402   : > { %4443 = vst [vmem:[#allocation2 + $0xa] sm:$0x3] %v6165_v28  ;;  %v6119_v33 = vpop.f32.mrb[11].mxu1 }
 0x407   : > { %v4470_v28 = vld [vmem:[#allocation2 + $0x8] sm:$0x3] (!%p5221_p5) }
 0x409   : > { %v4471_v27 = vld [vmem:[#allocation2 + $0xa] sm:$0x3] (!%p5221_p5) }
 0x41c   : > { %4449 = sbr.rel (%p5221_p5) target bundleno = 1131 (0x46b), region = 88 }
 0x41d   : > { %v4336_v35 = vpop.f32.mrb[12].mxu0 }
 0x41e   : > { %v6166_v37 = vadd.f32 %v4336_v35, %v1076_v32  ;;  %v6138_v38 = vpop.f32.mrb[13].mxu0 }
 0x41f   : > { %v4339_v26 = vpop.f32.mrb[14].mxu0  ;;  %v4424_v39 = vpop.f32.mrb[12].mxu1 }
 0x420   : > { %4444 = vst [vmem:[#allocation2 + $0xc] sm:$0x3] %v6166_v37  ;;  %v6167_v41 = vadd.f32 %v4424_v39, %v1077_v34  ;;  %v6139_v42 = vpop.f32.mrb[15].mxu0  ;;  %v6158_v43 = vpop.f32.mrb[13].mxu1 }
 0x421   : > { %v4427_v45 = vpop.f32.mrb[14].mxu1 }
 0x422   : > { %4445 = vst [vmem:[#allocation2 + $0xe] sm:$0x3] %v6167_v41  ;;  %v6159_v46 = vpop.f32.mrb[15].mxu1 }
 0x427   : > { %v4472_v45 = vld [vmem:[#allocation2 + $0xc] sm:$0x3] }
 0x429   : > { %v4473_v42 = vld [vmem:[#allocation2 + $0xe] sm:$0x3] }
 0x441   : > { %v4503_v15 = vpop.permute.xlu1 %4502 }
 0x442   : > { %v4532_v19 = vmul.f32 %v4503_v15, %v4468_v16 }
 0x443   : > { %v4493_v40 = vpop.permute.xlu0 %4492 }
 0x444   : > { %v4530_v50 = vmul.f32 %v4493_v40, %v4466_v44  ;;  %v4571_v29 = vrot.slane %v4532_v19, 7  ;;  %v4549_v32 = vrot.slane %v4532_v19, 6 }
 0x445   : > { %v4508_v20 = vpop.permute.xlu1 %4507 }
 0x446   : > { %v4533_v21 = vmul.f32 %v4508_v20, %v4469_v17  ;;  %v4569_v23 = vrot.slane %v4530_v50, 1 }
 0x447   : > { %v4498_v22 = vpop.permute.xlu0 %4497 }
 0x448   : > { %v4531_v25 = vmul.f32 %v4498_v22, %v4467_v18  ;;  %v4573_v35 = vrot.slane %v4533_v21, 6  ;;  %v4552_v38 = vrot.slane %v4533_v21, 5 }
 0x449   : > { %v4518_v33 = vpop.permute.xlu1 %4517 }
 0x44a   : > { %v4546_v30 = vrot.slane %v4531_v25, 7  ;;  %v4570_v31 = vsel %vm4547_vm9, %v4531_v25, %v4569_v23  ;;  %v4535_v34 = vmul.f32 %v4518_v33, %v4471_v27 }
 0x44b   : > { %v4572_v39 = vsel %vm4550_vm13, %v4571_v29, %v4570_v31 }
 0x44c   : > { %v4548_v26 = vsel %vm4547_vm9, %v4546_v30, %v4530_v50  ;;  %v4558_v51 = vrot.slane %v4535_v34, 3  ;;  %v4577_v53 = vrot.slane %v4535_v34, 4  ;;  %v4574_v56 = vsel %vm4553_vm15, %v4573_v35, %v4572_v39 }
 0x44d   : > { %v4551_v43 = vsel %vm4550_vm13, %v4549_v32, %v4548_v26 }
 0x44e   : > { %v4554_v46 = vsel %vm4553_vm15, %v4552_v38, %v4551_v43 }
 0x45f   : > { %v4513_v37 = vpop.permute.xlu0 %4512 }
 0x460   : > { %v4534_v41 = vmul.f32 %v4513_v37, %v4470_v28 }
 0x461   : > { %v4528_v49 = vpop.permute.xlu1 %4527 }
 0x462   : > { %v4555_v47 = vrot.slane %v4534_v41, 4  ;;  %v4575_v48 = vrot.slane %v4534_v41, 5  ;;  %v4537_v52 = vmul.f32 %v4528_v49, %v4473_v42 }
 0x463   : > { %v4523_v54 = vpop.permute.xlu0 %4522 }
 0x464   : > { %v4557_v55 = vsel %vm4556_vm10, %v4555_v47, %v4554_v46  ;;  %v4576_v57 = vsel %vm4556_vm10, %v4575_v48, %v4574_v56  ;;  %v4536_v58 = vmul.f32 %v4523_v54, %v4472_v45  ;;  %v4564_v59 = vrot.slane %v4537_v52, 1 }
 0x465   : > { %v4581_v60 = vrot.slane %v4537_v52, 2  ;;  %v4560_v63 = vsel %vm4559_vm5, %v4558_v51, %v4557_v55  ;;  %v4578_v0 = vsel %vm4559_vm5, %v4577_v53, %v4576_v57 }
 0x466   : > { %v4561_v61 = vrot.slane %v4536_v58, 2  ;;  %v4579_v62 = vrot.slane %v4536_v58, 3 }
 0x468   : > { %v4563_v1 = vsel %vm4562_vm11, %v4561_v61, %v4560_v63  ;;  %v4580_v2 = vsel %vm4562_vm11, %v4579_v62, %v4578_v0 }
 0x469   : > { %v4566_v3 = vsel %vm4565_vm7, %v4564_v59, %v4563_v1  ;;  %v4582_v5 = vsel %vm4565_vm7, %v4581_v60, %v4580_v2 }
 0x46a   : > { %4568 = vst [vmem:[%s7343_s17] sm:$0xff] %v4566_v3  ;;  %4584 = vst [vmem:[%s7343_s17 + $0x8] sm:$0xff] %v4582_v5 }
 0x46b PF: > { %s8542_s8 = sld [smem:[#allocation38_spill]]  ;;  %s8543_s23 = sld [smem:[#allocation41_spill]] }
 0x46c   : > { %s8544_s10 = sld [smem:[#allocation47_spill]]  ;;  %s4600_s12 = sshll.u32 %s7343_s17, 4  ;;  %s4601_s12 = int_to_ptr.vmem [resolvable:$true] %s4600_s12 }
 0x46d   : > { %s4586_s29 = scalar_lea.sflag [#allocation6], %s700_s25  ;;  %s6792_s3 = scalar_lea.vmem %s4601_s12, 256 }
 0x46e   : > { %p6793_p8 = scmp.ne.s32.totalorder %s4601_s12, %s6792_s3  ;;  %s6963_s21 = smov [#allocation16]  }
 0x46f   : > { %s6796_s19 = sshll.u32 %s6963_s21, 4  ;;  %s6797_s19 = int_to_ptr.vmem [resolvable:$false] %s6796_s19 }
 0x470   : > { %s6798_s22 = scalar_lea.vmem %s6797_s19, 512  ;;  %p6799_p1 = scmp.lt.s32.totalorder %s4601_s12, %s6797_s19 }
 0x471   : > { %s5231_s30 = sshll.u32 %s8542_s8, 8  ;;  %p8546_p7 = scmp.ne.s32.totalorder %s8543_s23, 0 }
 0x472   : > { %s8545_s18 = smov %s8544_s10  ;;  %s8357_s27 = scalar_lea.hbm %s8544_s10, %s5231_s30 }
 0x473   : > { %p6794_p12 = pnand %p6793_p8, %p8546_p7  ;;  %p6800_p9 = scmp.lt.s32.totalorder %s6798_s22, %s6792_s3 }
 0x475   : > { %p6795_p6 = pneg %p6794_p12  ;;  %p6801_p11 = por %p6800_p9, %p6799_p1 }
 0x477   : > { %p6802_p10 = pnand %p6801_p11, %p6795_p6 }
 0x479   : > { %6805 = shalt.err (!%p6802_p10)
}
 0x47a   : > { %s6806_s25 = scalar_lea.hbm %s8357_s27, 256  ;;  %s6810_s24 = scalar_lea.hbm %s8545_s18, 512 }
 0x47b   : > { %p6807_p13 = scmp.ne.s32.totalorder %s8357_s27, %s6806_s25  ;;  %p6811_p3 = scmp.lt.u32.totalorder %s8357_s27, %s8545_s18 }
 0x47c   : > { %p6812_p4 = scmp.lt.u32.totalorder %s6810_s24, %s6806_s25  ;;  %p6814_p8 = scmp.lt.u32.totalorder %s6806_s25, %s8357_s27 }
 0x47d   : > { %p6808_p0 = pnand %p6807_p13, %p8546_p7 }
 0x47e   : > { %p6813_p5 = por %p6812_p4, %p6811_p3 }
 0x47f   : > { %p6809_p2 = pneg %p6808_p0 }
 0x480   : > { %p6815_p12 = por %p6814_p8, %p6813_p5 }
 0x482   : > { %p6816_p6 = pnand %p6815_p12, %p6809_p2 }
 0x484   : > { %6819 = shalt.err (!%p6816_p6)
}
 0x485   : > { %6306 = dma.vmem_to_hbm [thread:$0]  (%p8546_p7), %s4601_s12, 256, %s8357_s27, %s4586_s29  }
 0x486 PF: > { %s8547_s8 = sld [smem:[#allocation34_spill]]  ;;  %s8548_s30 = sld [smem:[#allocation44_spill]] }
 0x487   : > { %p6312_p1 = scmp.ge.s32.totalorder %s6926_s15, 2 }
 0x48c   : > { %s4612_s11 = sand.u32 1, %s8547_s8   ;;  %p8549_p9 = scmp.ne.s32.totalorder %s8548_s30, 0 }
 0x48d   : > { %s4613_s16 = scalar_lea.sflag [#allocation6], %s4612_s11 }
 0x48e   : > { %p6309_p11 = pnand %p6312_p1, %p8549_p9 }
 0x490   : > { %6881 = dma.done.wait (!%p6309_p11), %s4613_s16, 256  }
 0x491   : > { %6883 = vsyncadd (!%p6309_p11), %s4613_s16, 4294967040  ;;  %s33_s15 = sadd.s32 1, %s6926_s15   ;;  %s8550_s10 = sld [smem:[#allocation35_spill]] }
 0x492   : > { %p30_p10 = scmp.ge.s32.totalorder %s33_s15, 6   ;;  %s8551_s29 = sld [smem:[#allocation42_spill]] }
 0x493   : > { %s8552_s23 = sld [smem:[#allocation36_spill]]  ;;  %s8553_s12 = sld [smem:[#allocation43_spill]] }
 0x494   : > { %s8554_s3 = sld [smem:[#allocation39_spill]]  ;;  %s8555_s21 = sld [smem:[#allocation40_spill]] }
 0x495   : > { %s8556_s27 = smov %s6890_s28  ;;  %s8558_s30 = smov %s6902_s9 }
 0x496   : > { %s8561_s11 = smov %s6918_s13  ;;  %32 = sbr.rel (!%p30_p10) target bundleno = 19 (0x13), region = 200 }
 0x497   : > { %s8557_s28 = smov %s8550_s10 }
 0x499   : > { %s8559_s9 = smov %s8552_s23  ;;  %s8560_s10 = smov %s8553_s12 }
 0x49a   : > { %s8562_s12 = smov %s6922_s14  ;;  %s8563_s13 = smov %s8554_s3 }
 0x49b   : > { %s8564_s14 = smov %s8555_s21 }
 0x49d   :  { %4618 = vsyncpa [#allocation5], 1 }
 0x49e   :  { %4620 = vsyncpa [#allocation5 + $0x1], 1 }
 0x49f   :  { %4621 = vsyncpa [#allocation8], 1 }
 0x4a0   :  { %4623 = vsyncpa [#allocation8 + $0x1], 1 }
 0x4a1   :  { %4624 = vsyncpa [#allocation11], 1 }
 0x4a2   :  { %4626 = vsyncpa [#allocation11 + $0x1], 1 }
 0x4a3   :  { %4627 = vsyncpa [#allocation14], 1 }
 0x4a4   :  { %4629 = vsyncpa [#allocation14 + $0x1], 1 }
 0x4a5   :  { %4630 = vsyncpa [#allocation6], 1 }
 0x4a6   :  { %4632 = vsyncpa [#allocation6 + $0x1], 1 }

</bundles_post_ra>
